<compile_context>
chip_gen: v7x
topology: tpu7x:2x2x1
jax: 0.10.0
libtpu: 0.0.40
codegen_flags: <defaults>
</compile_context>

<pallas_src>
import functools

import jax
import jax.numpy as jnp
from jax.experimental import pallas as pl
from jax.experimental.pallas import tpu as pltpu

BN_EPS = 1e-5


def _mlp_kernel(x_ref, w1_ref, vecs_ref, w2_hbm, w3_hbm, o_ref,
                w2_vmem, w3_vmem, sem, *, dims):
  """Whole 3-layer MLP in VMEM: bf16 matmul + f32 tanh/batch-norm per layer.

  dims = (d1, d2, d3) output widths of the three layers.  vecs_ref is a
  (3, d1+d2+d3) f32 array: row 0 = bias, row 1 = gamma, row 2 = beta,
  concatenated over layers along the lane axis.
  """
  d1, d2, d3 = dims
  B = x_ref.shape[0]
  inv_b = 1.0 / float(B)

  # Kick off layer-2/3 weight loads immediately; they complete under the
  # layer-1 (and layer-2) compute.
  cp2 = pltpu.make_async_copy(w2_hbm, w2_vmem, sem.at[0])
  cp2.start()
  cp3 = pltpu.make_async_copy(w3_hbm, w3_vmem, sem.at[1])
  cp3.start()

  vecs = vecs_ref[...]  # (3, d1+d2+d3) f32 — tiny, load once.

  def layer(h_f32, w_bf16, off, dout):
    b = vecs[0:1, off:off + dout]
    g = vecs[1:2, off:off + dout]
    be = vecs[2:3, off:off + dout]
    # Linear on the MXU: bf16 x bf16 -> f32 accumulate.
    z = jnp.dot(h_f32.astype(jnp.bfloat16), w_bf16,
                preferred_element_type=jnp.float32) + b
    # Tanh activation (EUP, f32).
    a = jnp.tanh(z)
    # BatchNorm1d training-mode stats, single reduction pass (biased var).
    mean = jnp.sum(a, axis=0, keepdims=True) * inv_b
    msq = jnp.sum(a * a, axis=0, keepdims=True) * inv_b
    var = jnp.maximum(msq - mean * mean, 0.0)
    # Fold normalize + affine into one per-element FMA:
    #   (a - mean) * rsqrt(var+eps) * g + be  ==  a * scale + shift
    scale = g * jax.lax.rsqrt(var + BN_EPS)   # (1, dout) — cheap, per column
    shift = be - mean * scale                 # (1, dout)
    # Dropout is identity (eval semantics).
    return a * scale + shift

  h = x_ref[...].astype(jnp.float32)
  h = layer(h, w1_ref[...], 0, d1)          # layer 1 (w1 auto-pipelined)
  cp2.wait()
  h = layer(h, w2_vmem[...], d1, d2)        # layer 2 (prefetched)
  cp3.wait()
  h = layer(h, w3_vmem[...], d1 + d2, d3)   # layer 3 (prefetched)
  o_ref[...] = h.astype(o_ref.dtype)


def _full_spec(shape):
  # One grid point; the array is a single full-extent VMEM block.
  return pl.BlockSpec(shape, lambda i: tuple(0 for _ in shape))


@jax.jit
def mlp_forward(x, params):
  """params = [(W_t, b, gamma, beta)] * 3 with W_t of shape (in, out), f32."""
  B, F0 = x.shape
  d1 = params[0][0].shape[1]
  d2 = params[1][0].shape[1]
  d3 = params[2][0].shape[1]

  # bf16 weights: halves the dominant HBM->VMEM traffic, native MXU passes.
  w1 = params[0][0].astype(jnp.bfloat16)
  w2 = params[1][0].astype(jnp.bfloat16)
  w3 = params[2][0].astype(jnp.bfloat16)

  # Pack the 9 tiny per-layer vectors into one (3, d1+d2+d3) f32 array.
  bias = jnp.concatenate([p[1] for p in params], axis=1)
  gamma = jnp.concatenate([p[2] for p in params], axis=1)
  beta = jnp.concatenate([p[3] for p in params], axis=1)
  vecs = jnp.concatenate([bias, gamma, beta], axis=0)  # (3, d1+d2+d3)

  flops = 2 * B * (F0 * d1 + d1 * d2 + d2 * d3)
  transcendentals = B * (d1 + d2 + d3)
  bytes_accessed = (x.size * 4 + (w1.size + w2.size + w3.size) * 2
                    + vecs.size * 4 + B * d3 * 4)

  kernel = functools.partial(_mlp_kernel, dims=(d1, d2, d3))

  return pl.pallas_call(
      kernel,
      out_shape=jax.ShapeDtypeStruct((B, d3), jnp.float32),
      grid=(1,),
      in_specs=[
          _full_spec((B, F0)),                    # x
          _full_spec((F0, d1)),                   # w1 (auto-DMA, needed first)
          _full_spec((3, d1 + d2 + d3)),          # packed bias/gamma/beta
          pl.BlockSpec(memory_space=pl.ANY),      # w2 stays in HBM, manual DMA
          pl.BlockSpec(memory_space=pl.ANY),      # w3 stays in HBM, manual DMA
      ],
      out_specs=_full_spec((B, d3)),
      scratch_shapes=[
          pltpu.VMEM((d1, d2), jnp.bfloat16),     # w2 landing buffer
          pltpu.VMEM((d2, d3), jnp.bfloat16),     # w3 landing buffer
          pltpu.SemaphoreType.DMA((2,)),
      ],
      compiler_params=pltpu.CompilerParams(
          dimension_semantics=("arbitrary",),
          vmem_limit_bytes=16 << 20),
      cost_estimate=pl.CostEstimate(
          flops=flops,
          transcendentals=transcendentals,
          bytes_accessed=bytes_accessed),
  )(x, w1, vecs, w2, w3)


def init_params(key, hidden_dim):
  """Deterministic init mirroring the module's shapes (f32 masters).

  Forward only uses the first 3 Linears (zip truncation), so only those are
  built.  Linear weights are returned transposed to (in, out).
  """
  dims_in = [hidden_dim[0]] + hidden_dim[:-1]      # [h0, h0, h1]
  dims_out = [hidden_dim[0]] + hidden_dim[1:]      # [h0, h1, h2]
  params = []
  for i, (din, dout) in enumerate(zip(dims_in, dims_out)):
    kw, kb = jax.random.split(jax.random.fold_in(key, i))
    bound = 1.0 / jnp.sqrt(jnp.float32(din))
    w_t = jax.random.uniform(kw, (din, dout), jnp.float32, -bound, bound)
    b = jax.random.uniform(kb, (1, dout), jnp.float32, -bound, bound)
    gamma = jnp.ones((1, dout), jnp.float32)   # BatchNorm1d defaults
    beta = jnp.zeros((1, dout), jnp.float32)
    params.append((w_t, b, gamma, beta))
  return params


def reference_forward(x, params):
  """Pure-JAX reference mirroring the kernel numerics (bf16 matmul inputs,
  f32 accumulation, one-pass biased BN variance)."""
  h = x
  for (w, b, g, be) in params:
    z = jnp.dot(h.astype(jnp.bfloat16), w.astype(jnp.bfloat16),
                preferred_element_type=jnp.float32) + b
    a = jnp.tanh(z)
    mean = jnp.mean(a, axis=0, keepdims=True)
    var = jnp.maximum(jnp.mean(a * a, axis=0, keepdims=True) - mean * mean, 0.0)
    h = (a - mean) * jax.lax.rsqrt(var + BN_EPS) * g + be
  return h


if __name__ == "__main__":
  # Small shapes consistent with the module: hidden_dim=[256, 512, 128], B=8.
  hidden_dim = [256, 512, 128]
  batch = 8

  key = jax.random.PRNGKey(0)
  kx, kp = jax.random.split(key)
  x = jax.random.normal(kx, (batch, hidden_dim[0]), jnp.float32)
  params = init_params(kp, hidden_dim)

  out = mlp_forward(x, params)
  out = jax.block_until_ready(out)

  ref = reference_forward(x, params)
  assert out.shape == (batch, hidden_dim[-1])
  assert jnp.allclose(out, ref, atol=2e-3, rtol=2e-3), "mismatch vs JAX reference"

  print("KERNEL_OK")
</pallas_src>

<mosaic_0001>
module attributes {stable_mosaic.version = 11 : i64} {
  func.func @_mlp_kernel(%arg0: i32, %arg1: memref<8x256xf32, #tpu.memory_space<vmem>>, %arg2: memref<256x256xbf16, #tpu.memory_space<vmem>>, %arg3: memref<3x896xf32, #tpu.memory_space<vmem>>, %arg4: memref<256x512xbf16, #tpu.memory_space<any>>, %arg5: memref<512x128xbf16, #tpu.memory_space<any>>, %arg6: memref<8x128xf32, #tpu.memory_space<vmem>>, %arg7: memref<256x512xbf16, #tpu.memory_space<vmem>>, %arg8: memref<512x128xbf16, #tpu.memory_space<vmem>>, %arg9: memref<2x!tpu.dma_semaphore, #tpu.memory_space<semaphore_mem>>) attributes {dimension_semantics = [#tpu.dimension_semantics<arbitrary>], iteration_bounds = array<i64: 1>, scalar_prefetch = 0 : i64, scratch_operands = 3 : i64, tpu.core_type = #tpu.core_type<tc>, window_params = [{pipeline_mode = #tpu.pipeline_mode<synchronous>, transform_indices = @transform_0, window_bounds = array<i64: 8, 256>}, {pipeline_mode = #tpu.pipeline_mode<synchronous>, transform_indices = @transform_1, window_bounds = array<i64: 256, 256>}, {pipeline_mode = #tpu.pipeline_mode<synchronous>, transform_indices = @transform_2, window_bounds = array<i64: 3, 896>}, {}, {}, {pipeline_mode = #tpu.pipeline_mode<synchronous>, transform_indices = @transform_5, window_bounds = array<i64: 8, 128>}]} {
    %c0_i32 = arith.constant 0 : i32
    %0 = tpu.memref_slice %arg9[%c0_i32] : memref<2x!tpu.dma_semaphore, #tpu.memory_space<semaphore_mem>> -> memref<1x!tpu.dma_semaphore, #tpu.memory_space<semaphore_mem>>
    %1 = tpu.memref_squeeze %0 : memref<1x!tpu.dma_semaphore, #tpu.memory_space<semaphore_mem>> -> memref<!tpu.dma_semaphore, #tpu.memory_space<semaphore_mem>>
    tpu.enqueue_dma source(%arg4 : memref<256x512xbf16, #tpu.memory_space<any>>) target(%arg7 : memref<256x512xbf16, #tpu.memory_space<vmem>>) target_semaphore(%1 : memref<!tpu.dma_semaphore, #tpu.memory_space<semaphore_mem>>)
    %c1_i32 = arith.constant 1 : i32
    %2 = tpu.memref_slice %arg9[%c1_i32] : memref<2x!tpu.dma_semaphore, #tpu.memory_space<semaphore_mem>> -> memref<1x!tpu.dma_semaphore, #tpu.memory_space<semaphore_mem>>
    %3 = tpu.memref_squeeze %2 : memref<1x!tpu.dma_semaphore, #tpu.memory_space<semaphore_mem>> -> memref<!tpu.dma_semaphore, #tpu.memory_space<semaphore_mem>>
    tpu.enqueue_dma source(%arg5 : memref<512x128xbf16, #tpu.memory_space<any>>) target(%arg8 : memref<512x128xbf16, #tpu.memory_space<vmem>>) target_semaphore(%3 : memref<!tpu.dma_semaphore, #tpu.memory_space<semaphore_mem>>)
    %c0 = arith.constant 0 : index
    %c0_0 = arith.constant 0 : index
    %4 = vector.load %arg3[%c0, %c0_0] : memref<3x896xf32, #tpu.memory_space<vmem>>, vector<3x896xf32>
    %c0_1 = arith.constant 0 : index
    %c0_2 = arith.constant 0 : index
    %5 = vector.load %arg1[%c0_1, %c0_2] : memref<8x256xf32, #tpu.memory_space<vmem>>, vector<8x256xf32>
    %c0_3 = arith.constant 0 : index
    %c0_4 = arith.constant 0 : index
    %6 = vector.load %arg2[%c0_3, %c0_4] : memref<256x256xbf16, #tpu.memory_space<vmem>>, vector<256x256xbf16>
    %7 = vector.extract_strided_slice %4 {offsets = [0, 0], sizes = [1, 256], strides = [1, 1]} : vector<3x896xf32> to vector<1x256xf32>
    %8 = vector.extract_strided_slice %4 {offsets = [1, 0], sizes = [1, 256], strides = [1, 1]} : vector<3x896xf32> to vector<1x256xf32>
    %9 = vector.extract_strided_slice %4 {offsets = [2, 0], sizes = [1, 256], strides = [1, 1]} : vector<3x896xf32> to vector<1x256xf32>
    %10 = arith.truncf %5 : vector<8x256xf32> to vector<8x256xbf16>
    %cst = arith.constant dense<0.000000e+00> : vector<8x256xf32>
    %11 = tpu.matmul %10, %6, %cst {dimension_numbers = #tpu.dot_dimension_numbers<[1], [0], [0], [1], [0, 0, 1, 1], [], []>} : vector<8x256xbf16>, vector<256x256xbf16>, vector<8x256xf32> -> vector<8x256xf32>
    %12 = vector.broadcast %7 : vector<1x256xf32> to vector<8x256xf32>
    %13 = arith.addf %11, %12 : vector<8x256xf32>
    %14 = math.tanh %13 : vector<8x256xf32>
    %cst_5 = arith.constant dense<0.000000e+00> : vector<256xf32>
    %15 = vector.multi_reduction <add>, %14, %cst_5 [0] : vector<8x256xf32> to vector<256xf32>
    %16 = vector.shape_cast %15 : vector<256xf32> to vector<1x256xf32>
    %cst_6 = arith.constant 1.250000e-01 : f32
    %17 = vector.broadcast %cst_6 : f32 to vector<1x256xf32>
    %18 = arith.mulf %16, %17 : vector<1x256xf32>
    %19 = arith.mulf %14, %14 : vector<8x256xf32>
    %cst_7 = arith.constant dense<0.000000e+00> : vector<256xf32>
    %20 = vector.multi_reduction <add>, %19, %cst_7 [0] : vector<8x256xf32> to vector<256xf32>
    %21 = vector.shape_cast %20 : vector<256xf32> to vector<1x256xf32>
    %cst_8 = arith.constant 1.250000e-01 : f32
    %22 = vector.broadcast %cst_8 : f32 to vector<1x256xf32>
    %23 = arith.mulf %21, %22 : vector<1x256xf32>
    %24 = arith.mulf %18, %18 : vector<1x256xf32>
    %25 = arith.subf %23, %24 : vector<1x256xf32>
    %cst_9 = arith.constant 0.000000e+00 : f32
    %26 = vector.broadcast %cst_9 : f32 to vector<1x256xf32>
    %27 = arith.maximumf %25, %26 : vector<1x256xf32>
    %cst_10 = arith.constant 9.99999974E-6 : f32
    %28 = vector.broadcast %cst_10 : f32 to vector<1x256xf32>
    %29 = arith.addf %27, %28 : vector<1x256xf32>
    %30 = math.rsqrt %29 : vector<1x256xf32>
    %31 = arith.mulf %8, %30 : vector<1x256xf32>
    %32 = arith.mulf %18, %31 : vector<1x256xf32>
    %33 = arith.subf %9, %32 : vector<1x256xf32>
    %34 = vector.broadcast %31 : vector<1x256xf32> to vector<8x256xf32>
    %35 = arith.mulf %14, %34 : vector<8x256xf32>
    %36 = vector.broadcast %33 : vector<1x256xf32> to vector<8x256xf32>
    %37 = arith.addf %35, %36 : vector<8x256xf32>
    %c0_i32_11 = arith.constant 0 : i32
    %38 = tpu.memref_slice %arg9[%c0_i32_11] : memref<2x!tpu.dma_semaphore, #tpu.memory_space<semaphore_mem>> -> memref<1x!tpu.dma_semaphore, #tpu.memory_space<semaphore_mem>>
    %39 = tpu.memref_squeeze %38 : memref<1x!tpu.dma_semaphore, #tpu.memory_space<semaphore_mem>> -> memref<!tpu.dma_semaphore, #tpu.memory_space<semaphore_mem>>
    tpu.wait_dma2 semaphore(%39 : memref<!tpu.dma_semaphore, #tpu.memory_space<semaphore_mem>>) src(%arg4 : memref<256x512xbf16, #tpu.memory_space<any>>) dst(%arg7 : memref<256x512xbf16, #tpu.memory_space<vmem>>)
    %c0_12 = arith.constant 0 : index
    %c0_13 = arith.constant 0 : index
    %40 = vector.load %arg7[%c0_12, %c0_13] : memref<256x512xbf16, #tpu.memory_space<vmem>>, vector<256x512xbf16>
    %41 = vector.extract_strided_slice %4 {offsets = [0, 256], sizes = [1, 512], strides = [1, 1]} : vector<3x896xf32> to vector<1x512xf32>
    %42 = vector.extract_strided_slice %4 {offsets = [1, 256], sizes = [1, 512], strides = [1, 1]} : vector<3x896xf32> to vector<1x512xf32>
    %43 = vector.extract_strided_slice %4 {offsets = [2, 256], sizes = [1, 512], strides = [1, 1]} : vector<3x896xf32> to vector<1x512xf32>
    %44 = arith.truncf %37 : vector<8x256xf32> to vector<8x256xbf16>
    %cst_14 = arith.constant dense<0.000000e+00> : vector<8x512xf32>
    %45 = tpu.matmul %44, %40, %cst_14 {dimension_numbers = #tpu.dot_dimension_numbers<[1], [0], [0], [1], [0, 0, 1, 1], [], []>} : vector<8x256xbf16>, vector<256x512xbf16>, vector<8x512xf32> -> vector<8x512xf32>
    %46 = vector.broadcast %41 : vector<1x512xf32> to vector<8x512xf32>
    %47 = arith.addf %45, %46 : vector<8x512xf32>
    %48 = math.tanh %47 : vector<8x512xf32>
    %cst_15 = arith.constant dense<0.000000e+00> : vector<512xf32>
    %49 = vector.multi_reduction <add>, %48, %cst_15 [0] : vector<8x512xf32> to vector<512xf32>
    %50 = vector.shape_cast %49 : vector<512xf32> to vector<1x512xf32>
    %cst_16 = arith.constant 1.250000e-01 : f32
    %51 = vector.broadcast %cst_16 : f32 to vector<1x512xf32>
    %52 = arith.mulf %50, %51 : vector<1x512xf32>
    %53 = arith.mulf %48, %48 : vector<8x512xf32>
    %cst_17 = arith.constant dense<0.000000e+00> : vector<512xf32>
    %54 = vector.multi_reduction <add>, %53, %cst_17 [0] : vector<8x512xf32> to vector<512xf32>
    %55 = vector.shape_cast %54 : vector<512xf32> to vector<1x512xf32>
    %cst_18 = arith.constant 1.250000e-01 : f32
    %56 = vector.broadcast %cst_18 : f32 to vector<1x512xf32>
    %57 = arith.mulf %55, %56 : vector<1x512xf32>
    %58 = arith.mulf %52, %52 : vector<1x512xf32>
    %59 = arith.subf %57, %58 : vector<1x512xf32>
    %cst_19 = arith.constant 0.000000e+00 : f32
    %60 = vector.broadcast %cst_19 : f32 to vector<1x512xf32>
    %61 = arith.maximumf %59, %60 : vector<1x512xf32>
    %cst_20 = arith.constant 9.99999974E-6 : f32
    %62 = vector.broadcast %cst_20 : f32 to vector<1x512xf32>
    %63 = arith.addf %61, %62 : vector<1x512xf32>
    %64 = math.rsqrt %63 : vector<1x512xf32>
    %65 = arith.mulf %42, %64 : vector<1x512xf32>
    %66 = arith.mulf %52, %65 : vector<1x512xf32>
    %67 = arith.subf %43, %66 : vector<1x512xf32>
    %68 = vector.broadcast %65 : vector<1x512xf32> to vector<8x512xf32>
    %69 = arith.mulf %48, %68 : vector<8x512xf32>
    %70 = vector.broadcast %67 : vector<1x512xf32> to vector<8x512xf32>
    %71 = arith.addf %69, %70 : vector<8x512xf32>
    %c1_i32_21 = arith.constant 1 : i32
    %72 = tpu.memref_slice %arg9[%c1_i32_21] : memref<2x!tpu.dma_semaphore, #tpu.memory_space<semaphore_mem>> -> memref<1x!tpu.dma_semaphore, #tpu.memory_space<semaphore_mem>>
    %73 = tpu.memref_squeeze %72 : memref<1x!tpu.dma_semaphore, #tpu.memory_space<semaphore_mem>> -> memref<!tpu.dma_semaphore, #tpu.memory_space<semaphore_mem>>
    tpu.wait_dma2 semaphore(%73 : memref<!tpu.dma_semaphore, #tpu.memory_space<semaphore_mem>>) src(%arg5 : memref<512x128xbf16, #tpu.memory_space<any>>) dst(%arg8 : memref<512x128xbf16, #tpu.memory_space<vmem>>)
    %c0_22 = arith.constant 0 : index
    %c0_23 = arith.constant 0 : index
    %74 = vector.load %arg8[%c0_22, %c0_23] : memref<512x128xbf16, #tpu.memory_space<vmem>>, vector<512x128xbf16>
    %75 = vector.extract_strided_slice %4 {offsets = [0, 768], sizes = [1, 128], strides = [1, 1]} : vector<3x896xf32> to vector<1x128xf32>
    %76 = vector.extract_strided_slice %4 {offsets = [1, 768], sizes = [1, 128], strides = [1, 1]} : vector<3x896xf32> to vector<1x128xf32>
    %77 = vector.extract_strided_slice %4 {offsets = [2, 768], sizes = [1, 128], strides = [1, 1]} : vector<3x896xf32> to vector<1x128xf32>
    %78 = arith.truncf %71 : vector<8x512xf32> to vector<8x512xbf16>
    %cst_24 = arith.constant dense<0.000000e+00> : vector<8x128xf32>
    %79 = tpu.matmul %78, %74, %cst_24 {dimension_numbers = #tpu.dot_dimension_numbers<[1], [0], [0], [1], [0, 0, 1, 1], [], []>} : vector<8x512xbf16>, vector<512x128xbf16>, vector<8x128xf32> -> vector<8x128xf32>
    %80 = vector.broadcast %75 : vector<1x128xf32> to vector<8x128xf32>
    %81 = arith.addf %79, %80 : vector<8x128xf32>
    %82 = math.tanh %81 : vector<8x128xf32>
    %cst_25 = arith.constant dense<0.000000e+00> : vector<128xf32>
    %83 = vector.multi_reduction <add>, %82, %cst_25 [0] : vector<8x128xf32> to vector<128xf32>
    %84 = vector.shape_cast %83 : vector<128xf32> to vector<1x128xf32>
    %cst_26 = arith.constant 1.250000e-01 : f32
    %85 = vector.broadcast %cst_26 : f32 to vector<1x128xf32>
    %86 = arith.mulf %84, %85 : vector<1x128xf32>
    %87 = arith.mulf %82, %82 : vector<8x128xf32>
    %cst_27 = arith.constant dense<0.000000e+00> : vector<128xf32>
    %88 = vector.multi_reduction <add>, %87, %cst_27 [0] : vector<8x128xf32> to vector<128xf32>
    %89 = vector.shape_cast %88 : vector<128xf32> to vector<1x128xf32>
    %cst_28 = arith.constant 1.250000e-01 : f32
    %90 = vector.broadcast %cst_28 : f32 to vector<1x128xf32>
    %91 = arith.mulf %89, %90 : vector<1x128xf32>
    %92 = arith.mulf %86, %86 : vector<1x128xf32>
    %93 = arith.subf %91, %92 : vector<1x128xf32>
    %cst_29 = arith.constant 0.000000e+00 : f32
    %94 = vector.broadcast %cst_29 : f32 to vector<1x128xf32>
    %95 = arith.maximumf %93, %94 : vector<1x128xf32>
    %cst_30 = arith.constant 9.99999974E-6 : f32
    %96 = vector.broadcast %cst_30 : f32 to vector<1x128xf32>
    %97 = arith.addf %95, %96 : vector<1x128xf32>
    %98 = math.rsqrt %97 : vector<1x128xf32>
    %99 = arith.mulf %76, %98 : vector<1x128xf32>
    %100 = arith.mulf %86, %99 : vector<1x128xf32>
    %101 = arith.subf %77, %100 : vector<1x128xf32>
    %102 = vector.broadcast %99 : vector<1x128xf32> to vector<8x128xf32>
    %103 = arith.mulf %82, %102 : vector<8x128xf32>
    %104 = vector.broadcast %101 : vector<1x128xf32> to vector<8x128xf32>
    %105 = arith.addf %103, %104 : vector<8x128xf32>
    %c0_31 = arith.constant 0 : index
    %c0_32 = arith.constant 0 : index
    %106 = vector.load %arg6[%c0_31, %c0_32] : memref<8x128xf32, #tpu.memory_space<vmem>>, vector<8x128xf32>
    tpu.vector_store %arg6[%c0_31, %c0_32], %105 {strides = array<i32>} : memref<8x128xf32, #tpu.memory_space<vmem>>, vector<8x128xf32>,
    return
  }
  func.func @transform_0(%arg0: i32) -> (i32, i32) {
    %c0_i32 = arith.constant 0 : i32
    %c0_i32_0 = arith.constant 0 : i32
    %c0_i32_1 = arith.constant 0 : i32
    return %c0_i32, %c0_i32_0 : i32, i32
  }
  func.func @transform_1(%arg0: i32) -> (i32, i32) {
    %c0_i32 = arith.constant 0 : i32
    %c0_i32_0 = arith.constant 0 : i32
    %c0_i32_1 = arith.constant 0 : i32
    return %c0_i32, %c0_i32_0 : i32, i32
  }
  func.func @transform_2(%arg0: i32) -> (i32, i32) {
    %c0_i32 = arith.constant 0 : i32
    %c0_i32_0 = arith.constant 0 : i32
    %c0_i32_1 = arith.constant 0 : i32
    return %c0_i32, %c0_i32_0 : i32, i32
  }
  func.func @transform_5(%arg0: i32) -> (i32, i32) {
    %c0_i32 = arith.constant 0 : i32
    %c0_i32_0 = arith.constant 0 : i32
    %c0_i32_1 = arith.constant 0 : i32
    return %c0_i32, %c0_i32_0 : i32, i32
  }
}

</mosaic_0001>

<bundles_post_ra>
// kernel: mlp_forward.1
= control target key start
LH: loop header
LB: loop body
LE: loop exit
PB: predicated region body
PF: predicated region fallthrough
CT: control target
= control target key end

     0   :  { %10 = vsyncpa [#allocation6], 0  ;;  %s2629_s0 = inlined_call_operand.vmem [shape: f32[8,256], index: 0, kind: input, shape index: {}]   ;;  %s2630_s1 = inlined_call_operand.vmem [shape: bf16[256,256], index: 1, kind: input, shape index: {}]   ;;  %s2631_s2 = inlined_call_operand.vmem [shape: f32[3,896], index: 2, kind: input, shape index: {}]   ;;  %s2632_s3 = inlined_call_operand.vmem [shape: bf16[256,512], index: 3, kind: input, shape index: {}]   ;;  %s2633_s4 = inlined_call_operand.vmem [shape: bf16[512,128], index: 4, kind: input, shape index: {}]   ;;  %s2634_s5 = inlined_call_operand.hbm [shape: f32[8,128], index: 5, kind: output, shape index: {}]  }
   0x1   :  { %v35_v0 = vld [vmem:[%s2632_s3] sm:$0xf]  ;;  %v37_v1 = vld [vmem:[%s2632_s3 + $0x10] sm:$0xf]  ;;  %v39_v2 = vld [vmem:[%s2632_s3 + $0x4] sm:$0xf] }
   0x2   :  { %36 = vst [vmem:[#allocation2] sm:$0xf] %v35_v0  ;;  %38 = vst [vmem:[#allocation2 + $0x4] sm:$0xf] %v37_v1  ;;  %v41_v3 = vld [vmem:[%s2632_s3 + $0x14] sm:$0xf] }
   0x3   :  { %v43_v4 = vld [vmem:[%s2632_s3 + $0x8] sm:$0xf]  ;;  %40 = vst [vmem:[#allocation2 + $0x8] sm:$0xf] %v39_v2  ;;  %42 = vst [vmem:[#allocation2 + $0xc] sm:$0xf] %v41_v3 }
   0x4   :  { %44 = vst [vmem:[#allocation2 + $0x10] sm:$0xf] %v43_v4  ;;  %v45_v5 = vld [vmem:[%s2632_s3 + $0x18] sm:$0xf]  ;;  %v47_v6 = vld [vmem:[%s2632_s3 + $0xc] sm:$0xf] }
   0x5   :  { %v49_v7 = vld [vmem:[%s2632_s3 + $0x1c] sm:$0xff]   ;;  %46 = vst [vmem:[#allocation2 + $0x14] sm:$0xf] %v45_v5  ;;  %48 = vst [vmem:[#allocation2 + $0x18] sm:$0xf] %v47_v6 }
   0x6   :  { %50 = vst [vmem:[#allocation2 + $0x1c] sm:$0xff] %v49_v7   ;;  %v53_v8 = vld [vmem:[%s2632_s3 + $0x30] sm:$0xf]  ;;  %v55_v9 = vld [vmem:[%s2632_s3 + $0x24] sm:$0xf]  ;;  %v65_v14 = vld [vmem:[%s2632_s3 + $0x3c] sm:$0xff]  }
   0x7   :  { %v57_v10 = vld [vmem:[%s2632_s3 + $0x34] sm:$0xf]  ;;  %54 = vst [vmem:[#allocation2 + $0x24] sm:$0xf] %v53_v8  ;;  %56 = vst [vmem:[#allocation2 + $0x28] sm:$0xf] %v55_v9 }
   0x8   :  { %58 = vst [vmem:[#allocation2 + $0x2c] sm:$0xf] %v57_v10  ;;  %v59_v11 = vld [vmem:[%s2632_s3 + $0x28] sm:$0xf]  ;;  %v61_v12 = vld [vmem:[%s2632_s3 + $0x38] sm:$0xf] }
   0x9   :  { %v63_v13 = vld [vmem:[%s2632_s3 + $0x2c] sm:$0xf]  ;;  %60 = vst [vmem:[#allocation2 + $0x30] sm:$0xf] %v59_v11  ;;  %62 = vst [vmem:[#allocation2 + $0x34] sm:$0xf] %v61_v12 }
   0xa   :  { %64 = vst [vmem:[#allocation2 + $0x38] sm:$0xf] %v63_v13  ;;  %v69_v15 = vld [vmem:[%s2632_s3 + $0x50] sm:$0xf]  ;;  %v71_v16 = vld [vmem:[%s2632_s3 + $0x44] sm:$0xf] }
   0xb   :  { %66 = vst [vmem:[#allocation2 + $0x3c] sm:$0xff] %v65_v14   ;;  %70 = vst [vmem:[#allocation2 + $0x44] sm:$0xf] %v69_v15  ;;  %v73_v17 = vld [vmem:[%s2632_s3 + $0x54] sm:$0xf]  ;;  %v81_v21 = vld [vmem:[%s2632_s3 + $0x5c] sm:$0xff]  }
   0xc   :  { %72 = vst [vmem:[#allocation2 + $0x48] sm:$0xf] %v71_v16  ;;  %v75_v18 = vld [vmem:[%s2632_s3 + $0x48] sm:$0xf]  ;;  %v77_v19 = vld [vmem:[%s2632_s3 + $0x58] sm:$0xf] }
   0xd   :  { %74 = vst [vmem:[#allocation2 + $0x4c] sm:$0xf] %v73_v17  ;;  %76 = vst [vmem:[#allocation2 + $0x50] sm:$0xf] %v75_v18  ;;  %v79_v20 = vld [vmem:[%s2632_s3 + $0x4c] sm:$0xf] }
   0xe   :  { %78 = vst [vmem:[#allocation2 + $0x54] sm:$0xf] %v77_v19  ;;  %v85_v22 = vld [vmem:[%s2632_s3 + $0x70] sm:$0xf]  ;;  %80 = vst [vmem:[#allocation2 + $0x58] sm:$0xf] %v79_v20 }
   0xf   :  { %82 = vst [vmem:[#allocation2 + $0x5c] sm:$0xff] %v81_v21   ;;  %86 = vst [vmem:[#allocation2 + $0x64] sm:$0xf] %v85_v22  ;;  %v87_v23 = vld [vmem:[%s2632_s3 + $0x64] sm:$0xf]  ;;  %v97_v28 = vld [vmem:[%s2632_s3 + $0x7c] sm:$0xff]  }
  0x10   :  { %v89_v24 = vld [vmem:[%s2632_s3 + $0x74] sm:$0xf]  ;;  %v91_v25 = vld [vmem:[%s2632_s3 + $0x68] sm:$0xf]  ;;  %88 = vst [vmem:[#allocation2 + $0x68] sm:$0xf] %v87_v23 }
  0x11   :  { %90 = vst [vmem:[#allocation2 + $0x6c] sm:$0xf] %v89_v24  ;;  %92 = vst [vmem:[#allocation2 + $0x70] sm:$0xf] %v91_v25  ;;  %v93_v26 = vld [vmem:[%s2632_s3 + $0x78] sm:$0xf] }
  0x12   :  { %v95_v27 = vld [vmem:[%s2632_s3 + $0x6c] sm:$0xf]  ;;  %94 = vst [vmem:[#allocation2 + $0x74] sm:$0xf] %v93_v26  ;;  %98 = vst [vmem:[#allocation2 + $0x7c] sm:$0xff] %v97_v28   ;;  %v113_v35 = vld [vmem:[%s2632_s3 + $0x9c] sm:$0xff]  }
  0x13   :  { %96 = vst [vmem:[#allocation2 + $0x78] sm:$0xf] %v95_v27  ;;  %v101_v29 = vld [vmem:[%s2632_s3 + $0x90] sm:$0xf]  ;;  %v103_v30 = vld [vmem:[%s2632_s3 + $0x84] sm:$0xf] }
  0x14   :  { %v105_v31 = vld [vmem:[%s2632_s3 + $0x94] sm:$0xf]  ;;  %102 = vst [vmem:[#allocation2 + $0x84] sm:$0xf] %v101_v29  ;;  %104 = vst [vmem:[#allocation2 + $0x88] sm:$0xf] %v103_v30 }
  0x15   :  { %106 = vst [vmem:[#allocation2 + $0x8c] sm:$0xf] %v105_v31  ;;  %v107_v32 = vld [vmem:[%s2632_s3 + $0x88] sm:$0xf]  ;;  %v109_v33 = vld [vmem:[%s2632_s3 + $0x98] sm:$0xf] }
  0x16   :  { %v111_v34 = vld [vmem:[%s2632_s3 + $0x8c] sm:$0xf]  ;;  %108 = vst [vmem:[#allocation2 + $0x90] sm:$0xf] %v107_v32  ;;  %110 = vst [vmem:[#allocation2 + $0x94] sm:$0xf] %v109_v33 }
  0x17   :  { %112 = vst [vmem:[#allocation2 + $0x98] sm:$0xf] %v111_v34  ;;  %v117_v36 = vld [vmem:[%s2632_s3 + $0xb0] sm:$0xf]  ;;  %v119_v37 = vld [vmem:[%s2632_s3 + $0xa4] sm:$0xf] }
  0x18   :  { %114 = vst [vmem:[#allocation2 + $0x9c] sm:$0xff] %v113_v35   ;;  %118 = vst [vmem:[#allocation2 + $0xa4] sm:$0xf] %v117_v36  ;;  %v121_v38 = vld [vmem:[%s2632_s3 + $0xb4] sm:$0xf]  ;;  %v129_v42 = vld [vmem:[%s2632_s3 + $0xbc] sm:$0xff]  }
  0x19   :  { %120 = vst [vmem:[#allocation2 + $0xa8] sm:$0xf] %v119_v37  ;;  %v123_v39 = vld [vmem:[%s2632_s3 + $0xa8] sm:$0xf]  ;;  %v125_v40 = vld [vmem:[%s2632_s3 + $0xb8] sm:$0xf] }
  0x1a   :  { %122 = vst [vmem:[#allocation2 + $0xac] sm:$0xf] %v121_v38  ;;  %124 = vst [vmem:[#allocation2 + $0xb0] sm:$0xf] %v123_v39  ;;  %v127_v41 = vld [vmem:[%s2632_s3 + $0xac] sm:$0xf] }
  0x1b   :  { %126 = vst [vmem:[#allocation2 + $0xb4] sm:$0xf] %v125_v40  ;;  %v133_v43 = vld [vmem:[%s2632_s3 + $0xd0] sm:$0xf]  ;;  %128 = vst [vmem:[#allocation2 + $0xb8] sm:$0xf] %v127_v41 }
  0x1c   :  { %130 = vst [vmem:[#allocation2 + $0xbc] sm:$0xff] %v129_v42   ;;  %134 = vst [vmem:[#allocation2 + $0xc4] sm:$0xf] %v133_v43  ;;  %v135_v44 = vld [vmem:[%s2632_s3 + $0xc4] sm:$0xf]  ;;  %v145_v49 = vld [vmem:[%s2632_s3 + $0xdc] sm:$0xff]  }
  0x1d   :  { %v137_v45 = vld [vmem:[%s2632_s3 + $0xd4] sm:$0xf]  ;;  %v139_v46 = vld [vmem:[%s2632_s3 + $0xc8] sm:$0xf]  ;;  %136 = vst [vmem:[#allocation2 + $0xc8] sm:$0xf] %v135_v44 }
  0x1e   :  { %138 = vst [vmem:[#allocation2 + $0xcc] sm:$0xf] %v137_v45  ;;  %140 = vst [vmem:[#allocation2 + $0xd0] sm:$0xf] %v139_v46  ;;  %v141_v47 = vld [vmem:[%s2632_s3 + $0xd8] sm:$0xf] }
  0x1f   :  { %v143_v48 = vld [vmem:[%s2632_s3 + $0xcc] sm:$0xf]  ;;  %142 = vst [vmem:[#allocation2 + $0xd4] sm:$0xf] %v141_v47  ;;  %146 = vst [vmem:[#allocation2 + $0xdc] sm:$0xff] %v145_v49   ;;  %v161_v56 = vld [vmem:[%s2632_s3 + $0xfc] sm:$0xff]  }
  0x20   :  { %144 = vst [vmem:[#allocation2 + $0xd8] sm:$0xf] %v143_v48  ;;  %v149_v50 = vld [vmem:[%s2632_s3 + $0xf0] sm:$0xf]  ;;  %v151_v51 = vld [vmem:[%s2632_s3 + $0xe4] sm:$0xf] }
  0x21   :  { %v153_v52 = vld [vmem:[%s2632_s3 + $0xf4] sm:$0xf]  ;;  %150 = vst [vmem:[#allocation2 + $0xe4] sm:$0xf] %v149_v50  ;;  %152 = vst [vmem:[#allocation2 + $0xe8] sm:$0xf] %v151_v51 }
  0x22   :  { %154 = vst [vmem:[#allocation2 + $0xec] sm:$0xf] %v153_v52  ;;  %v155_v53 = vld [vmem:[%s2632_s3 + $0xe8] sm:$0xf]  ;;  %v157_v54 = vld [vmem:[%s2632_s3 + $0xf8] sm:$0xf] }
  0x23   :  { %v159_v55 = vld [vmem:[%s2632_s3 + $0xec] sm:$0xf]  ;;  %156 = vst [vmem:[#allocation2 + $0xf0] sm:$0xf] %v155_v53  ;;  %158 = vst [vmem:[#allocation2 + $0xf4] sm:$0xf] %v157_v54 }
  0x24   :  { %160 = vst [vmem:[#allocation2 + $0xf8] sm:$0xf] %v159_v55  ;;  %v165_v57 = vld [vmem:[%s2632_s3 + $0x110] sm:$0xf]  ;;  %v167_v58 = vld [vmem:[%s2632_s3 + $0x104] sm:$0xf] }
  0x25   :  { %162 = vst [vmem:[#allocation2 + $0xfc] sm:$0xff] %v161_v56   ;;  %166 = vst [vmem:[#allocation2 + $0x104] sm:$0xf] %v165_v57  ;;  %v169_v59 = vld [vmem:[%s2632_s3 + $0x114] sm:$0xf]  ;;  %v177_v63 = vld [vmem:[%s2632_s3 + $0x11c] sm:$0xff]  }
  0x26   :  { %168 = vst [vmem:[#allocation2 + $0x108] sm:$0xf] %v167_v58  ;;  %v171_v60 = vld [vmem:[%s2632_s3 + $0x108] sm:$0xf]  ;;  %v173_v61 = vld [vmem:[%s2632_s3 + $0x118] sm:$0xf] }
  0x27   :  { %170 = vst [vmem:[#allocation2 + $0x10c] sm:$0xf] %v169_v59  ;;  %172 = vst [vmem:[#allocation2 + $0x110] sm:$0xf] %v171_v60  ;;  %v175_v62 = vld [vmem:[%s2632_s3 + $0x10c] sm:$0xf] }
  0x28   :  { %174 = vst [vmem:[#allocation2 + $0x114] sm:$0xf] %v173_v61  ;;  %v181_v0 = vld [vmem:[%s2632_s3 + $0x130] sm:$0xf]  ;;  %176 = vst [vmem:[#allocation2 + $0x118] sm:$0xf] %v175_v62 }
  0x29   :  { %178 = vst [vmem:[#allocation2 + $0x11c] sm:$0xff] %v177_v63   ;;  %182 = vst [vmem:[#allocation2 + $0x124] sm:$0xf] %v181_v0  ;;  %v183_v1 = vld [vmem:[%s2632_s3 + $0x124] sm:$0xf]  ;;  %v193_v6 = vld [vmem:[%s2632_s3 + $0x13c] sm:$0xff]  }
  0x2a   :  { %v185_v2 = vld [vmem:[%s2632_s3 + $0x134] sm:$0xf]  ;;  %v187_v3 = vld [vmem:[%s2632_s3 + $0x128] sm:$0xf]  ;;  %184 = vst [vmem:[#allocation2 + $0x128] sm:$0xf] %v183_v1 }
  0x2b   :  { %186 = vst [vmem:[#allocation2 + $0x12c] sm:$0xf] %v185_v2  ;;  %188 = vst [vmem:[#allocation2 + $0x130] sm:$0xf] %v187_v3  ;;  %v189_v4 = vld [vmem:[%s2632_s3 + $0x138] sm:$0xf] }
  0x2c   :  { %v191_v5 = vld [vmem:[%s2632_s3 + $0x12c] sm:$0xf]  ;;  %190 = vst [vmem:[#allocation2 + $0x134] sm:$0xf] %v189_v4  ;;  %194 = vst [vmem:[#allocation2 + $0x13c] sm:$0xff] %v193_v6   ;;  %v209_v13 = vld [vmem:[%s2632_s3 + $0x15c] sm:$0xff]  }
  0x2d   :  { %192 = vst [vmem:[#allocation2 + $0x138] sm:$0xf] %v191_v5  ;;  %v197_v7 = vld [vmem:[%s2632_s3 + $0x150] sm:$0xf]  ;;  %v199_v8 = vld [vmem:[%s2632_s3 + $0x144] sm:$0xf] }
  0x2e   :  { %v201_v9 = vld [vmem:[%s2632_s3 + $0x154] sm:$0xf]  ;;  %198 = vst [vmem:[#allocation2 + $0x144] sm:$0xf] %v197_v7  ;;  %200 = vst [vmem:[#allocation2 + $0x148] sm:$0xf] %v199_v8 }
  0x2f   :  { %202 = vst [vmem:[#allocation2 + $0x14c] sm:$0xf] %v201_v9  ;;  %v203_v10 = vld [vmem:[%s2632_s3 + $0x148] sm:$0xf]  ;;  %v205_v11 = vld [vmem:[%s2632_s3 + $0x158] sm:$0xf] }
  0x30   :  { %v207_v12 = vld [vmem:[%s2632_s3 + $0x14c] sm:$0xf]  ;;  %204 = vst [vmem:[#allocation2 + $0x150] sm:$0xf] %v203_v10  ;;  %206 = vst [vmem:[#allocation2 + $0x154] sm:$0xf] %v205_v11 }
  0x31   :  { %208 = vst [vmem:[#allocation2 + $0x158] sm:$0xf] %v207_v12  ;;  %v213_v14 = vld [vmem:[%s2632_s3 + $0x170] sm:$0xf]  ;;  %v215_v15 = vld [vmem:[%s2632_s3 + $0x164] sm:$0xf] }
  0x32   :  { %210 = vst [vmem:[#allocation2 + $0x15c] sm:$0xff] %v209_v13   ;;  %214 = vst [vmem:[#allocation2 + $0x164] sm:$0xf] %v213_v14  ;;  %v217_v16 = vld [vmem:[%s2632_s3 + $0x174] sm:$0xf]  ;;  %v225_v20 = vld [vmem:[%s2632_s3 + $0x17c] sm:$0xff]  }
  0x33   :  { %216 = vst [vmem:[#allocation2 + $0x168] sm:$0xf] %v215_v15  ;;  %v219_v17 = vld [vmem:[%s2632_s3 + $0x168] sm:$0xf]  ;;  %v221_v18 = vld [vmem:[%s2632_s3 + $0x178] sm:$0xf] }
  0x34   :  { %218 = vst [vmem:[#allocation2 + $0x16c] sm:$0xf] %v217_v16  ;;  %220 = vst [vmem:[#allocation2 + $0x170] sm:$0xf] %v219_v17  ;;  %v223_v19 = vld [vmem:[%s2632_s3 + $0x16c] sm:$0xf] }
  0x35   :  { %222 = vst [vmem:[#allocation2 + $0x174] sm:$0xf] %v221_v18  ;;  %v229_v21 = vld [vmem:[%s2632_s3 + $0x190] sm:$0xf]  ;;  %224 = vst [vmem:[#allocation2 + $0x178] sm:$0xf] %v223_v19 }
  0x36   :  { %226 = vst [vmem:[#allocation2 + $0x17c] sm:$0xff] %v225_v20   ;;  %230 = vst [vmem:[#allocation2 + $0x184] sm:$0xf] %v229_v21  ;;  %v231_v22 = vld [vmem:[%s2632_s3 + $0x184] sm:$0xf]  ;;  %v241_v27 = vld [vmem:[%s2632_s3 + $0x19c] sm:$0xff]  }
  0x37   :  { %v233_v23 = vld [vmem:[%s2632_s3 + $0x194] sm:$0xf]  ;;  %v235_v24 = vld [vmem:[%s2632_s3 + $0x188] sm:$0xf]  ;;  %232 = vst [vmem:[#allocation2 + $0x188] sm:$0xf] %v231_v22 }
  0x38   :  { %234 = vst [vmem:[#allocation2 + $0x18c] sm:$0xf] %v233_v23  ;;  %236 = vst [vmem:[#allocation2 + $0x190] sm:$0xf] %v235_v24  ;;  %v237_v25 = vld [vmem:[%s2632_s3 + $0x198] sm:$0xf] }
  0x39   :  { %v239_v26 = vld [vmem:[%s2632_s3 + $0x18c] sm:$0xf]  ;;  %238 = vst [vmem:[#allocation2 + $0x194] sm:$0xf] %v237_v25  ;;  %242 = vst [vmem:[#allocation2 + $0x19c] sm:$0xff] %v241_v27   ;;  %v257_v34 = vld [vmem:[%s2632_s3 + $0x1bc] sm:$0xff]  }
  0x3a   :  { %240 = vst [vmem:[#allocation2 + $0x198] sm:$0xf] %v239_v26  ;;  %v245_v28 = vld [vmem:[%s2632_s3 + $0x1b0] sm:$0xf]  ;;  %v247_v29 = vld [vmem:[%s2632_s3 + $0x1a4] sm:$0xf] }
  0x3b   :  { %v249_v30 = vld [vmem:[%s2632_s3 + $0x1b4] sm:$0xf]  ;;  %246 = vst [vmem:[#allocation2 + $0x1a4] sm:$0xf] %v245_v28  ;;  %248 = vst [vmem:[#allocation2 + $0x1a8] sm:$0xf] %v247_v29 }
  0x3c   :  { %250 = vst [vmem:[#allocation2 + $0x1ac] sm:$0xf] %v249_v30  ;;  %v251_v31 = vld [vmem:[%s2632_s3 + $0x1a8] sm:$0xf]  ;;  %v253_v32 = vld [vmem:[%s2632_s3 + $0x1b8] sm:$0xf] }
  0x3d   :  { %v255_v33 = vld [vmem:[%s2632_s3 + $0x1ac] sm:$0xf]  ;;  %252 = vst [vmem:[#allocation2 + $0x1b0] sm:$0xf] %v251_v31  ;;  %254 = vst [vmem:[#allocation2 + $0x1b4] sm:$0xf] %v253_v32 }
  0x3e   :  { %256 = vst [vmem:[#allocation2 + $0x1b8] sm:$0xf] %v255_v33  ;;  %v261_v35 = vld [vmem:[%s2632_s3 + $0x1d0] sm:$0xf]  ;;  %v263_v36 = vld [vmem:[%s2632_s3 + $0x1c4] sm:$0xf] }
  0x3f   :  { %258 = vst [vmem:[#allocation2 + $0x1bc] sm:$0xff] %v257_v34   ;;  %262 = vst [vmem:[#allocation2 + $0x1c4] sm:$0xf] %v261_v35  ;;  %v265_v37 = vld [vmem:[%s2632_s3 + $0x1d4] sm:$0xf]  ;;  %v273_v41 = vld [vmem:[%s2632_s3 + $0x1dc] sm:$0xff]  }
  0x40   :  { %264 = vst [vmem:[#allocation2 + $0x1c8] sm:$0xf] %v263_v36  ;;  %v267_v38 = vld [vmem:[%s2632_s3 + $0x1c8] sm:$0xf]  ;;  %v269_v39 = vld [vmem:[%s2632_s3 + $0x1d8] sm:$0xf] }
  0x41   :  { %266 = vst [vmem:[#allocation2 + $0x1cc] sm:$0xf] %v265_v37  ;;  %268 = vst [vmem:[#allocation2 + $0x1d0] sm:$0xf] %v267_v38  ;;  %v271_v40 = vld [vmem:[%s2632_s3 + $0x1cc] sm:$0xf] }
  0x42   :  { %270 = vst [vmem:[#allocation2 + $0x1d4] sm:$0xf] %v269_v39  ;;  %v277_v42 = vld [vmem:[%s2632_s3 + $0x1f0] sm:$0xf]  ;;  %272 = vst [vmem:[#allocation2 + $0x1d8] sm:$0xf] %v271_v40 }
  0x43   :  { %274 = vst [vmem:[#allocation2 + $0x1dc] sm:$0xff] %v273_v41   ;;  %278 = vst [vmem:[#allocation2 + $0x1e4] sm:$0xf] %v277_v42  ;;  %v279_v43 = vld [vmem:[%s2632_s3 + $0x1e4] sm:$0xf] }
  0x44   :  { %v281_v44 = vld [vmem:[%s2632_s3 + $0x1f4] sm:$0xf]  ;;  %v283_v45 = vld [vmem:[%s2632_s3 + $0x1e8] sm:$0xf]  ;;  %280 = vst [vmem:[#allocation2 + $0x1e8] sm:$0xf] %v279_v43 }
  0x45   :  { %282 = vst [vmem:[#allocation2 + $0x1ec] sm:$0xf] %v281_v44  ;;  %284 = vst [vmem:[#allocation2 + $0x1f0] sm:$0xf] %v283_v45  ;;  %v285_v46 = vld [vmem:[%s2632_s3 + $0x1f8] sm:$0xf] }
  0x46   :  { %v287_v47 = vld [vmem:[%s2632_s3 + $0x1ec] sm:$0xf]  ;;  %v289_v48 = vld [vmem:[%s2632_s3 + $0x1fc] sm:$0xf]  ;;  %286 = vst [vmem:[#allocation2 + $0x1f4] sm:$0xf] %v285_v46 }
  0x47   :  { %288 = vst [vmem:[#allocation2 + $0x1f8] sm:$0xf] %v287_v47  ;;  %290 = vst [vmem:[#allocation2 + $0x1fc] sm:$0xf] %v289_v48 }
  0x48   :  { %577 = vsyncadd [#allocation4], 8192  ;;  %v2200_v49 = vld [vmem:[%s2633_s4] sm:$0xff]  ;;  %v2205_v50 = vld [vmem:[%s2633_s4 + $0x8] sm:$0xff] }
  0x49   :  { %v2210_v51 = vld [vmem:[%s2633_s4 + $0x10] sm:$0xff]  ;;  %v2215_v52 = vld [vmem:[%s2633_s4 + $0x18] sm:$0xff]  ;;  %v2220_v53 = vld [vmem:[%s2633_s4 + $0x20] sm:$0xff] }
  0x4a   :  { %v2225_v54 = vld [vmem:[%s2633_s4 + $0x28] sm:$0xff]  ;;  %v2230_v55 = vld [vmem:[%s2633_s4 + $0x30] sm:$0xff]  ;;  %v2235_v56 = vld [vmem:[%s2633_s4 + $0x38] sm:$0xff] }
  0x4b   :  { %v2240_v57 = vld [vmem:[%s2633_s4 + $0x40] sm:$0xff]  ;;  %v2245_v58 = vld [vmem:[%s2633_s4 + $0x48] sm:$0xff]  ;;  %v2250_v59 = vld [vmem:[%s2633_s4 + $0x50] sm:$0xff] }
  0x4c   :  { %v2255_v60 = vld [vmem:[%s2633_s4 + $0x58] sm:$0xff]  ;;  %v2260_v61 = vld [vmem:[%s2633_s4 + $0x60] sm:$0xff]  ;;  %v2265_v62 = vld [vmem:[%s2633_s4 + $0x68] sm:$0xff] }
  0x4d   :  { %v2270_v63 = vld [vmem:[%s2633_s4 + $0x70] sm:$0xff]  ;;  %v2275_v0 = vld [vmem:[%s2633_s4 + $0x78] sm:$0xff]  ;;  %v2280_v1 = vld [vmem:[%s2633_s4 + $0x80] sm:$0xff] }
  0x4e   :  { %v2285_v2 = vld [vmem:[%s2633_s4 + $0x88] sm:$0xff]  ;;  %v2290_v3 = vld [vmem:[%s2633_s4 + $0x90] sm:$0xff]  ;;  %v2295_v4 = vld [vmem:[%s2633_s4 + $0x98] sm:$0xff] }
  0x4f   :  { %2637 = vst [vmem:[#allocation12_spill] sm:$0xff] %v2290_v3  ;;  %2638 = vst [vmem:[#allocation13_spill] sm:$0xff] %v2295_v4  ;;  %v2300_v5 = vld [vmem:[%s2633_s4 + $0xa0] sm:$0xff]  ;;  %v2305_v6 = vld [vmem:[%s2633_s4 + $0xa8] sm:$0xff] }
  0x50   :  { %2639 = vst [vmem:[#allocation14_spill] sm:$0xff] %v2300_v5  ;;  %2640 = vst [vmem:[#allocation15_spill] sm:$0xff] %v2305_v6  ;;  %v2310_v7 = vld [vmem:[%s2633_s4 + $0xb0] sm:$0xff]  ;;  %v2315_v8 = vld [vmem:[%s2633_s4 + $0xb8] sm:$0xff] }
  0x51   :  { %2641 = vst [vmem:[#allocation16_spill] sm:$0xff] %v2310_v7  ;;  %2642 = vst [vmem:[#allocation17_spill] sm:$0xff] %v2315_v8  ;;  %v2320_v9 = vld [vmem:[%s2633_s4 + $0xc0] sm:$0xff]  ;;  %v2325_v10 = vld [vmem:[%s2633_s4 + $0xc8] sm:$0xff] }
  0x52   :  { %v2330_v11 = vld [vmem:[%s2633_s4 + $0xd0] sm:$0xff]  ;;  %v2335_v12 = vld [vmem:[%s2633_s4 + $0xd8] sm:$0xff]  ;;  %v2340_v13 = vld [vmem:[%s2633_s4 + $0xe0] sm:$0xff] }
  0x53   :  { %2643 = vst [vmem:[#allocation18_spill] sm:$0xff] %v2335_v12  ;;  %2644 = vst [vmem:[#allocation19_spill] sm:$0xff] %v2340_v13  ;;  %v2345_v14 = vld [vmem:[%s2633_s4 + $0xe8] sm:$0xff]  ;;  %v2350_v15 = vld [vmem:[%s2633_s4 + $0xf0] sm:$0xff] }
  0x54   :  { %2645 = vst [vmem:[#allocation20_spill] sm:$0xff] %v2345_v14  ;;  %2646 = vst [vmem:[#allocation21_spill] sm:$0xff] %v2350_v15  ;;  %v2355_v16 = vld [vmem:[%s2633_s4 + $0xf8] sm:$0xff] }
  0x55   :  { %2647 = vst [vmem:[#allocation22_spill] sm:$0xff] %v2355_v16 }
  0x56   :  { %682 = vsyncadd [#allocation4 + $0x1], 4096  ;;  %v2360_v17 = vld [vmem:[%s2631_s2 + $0x8] sm:$0x77]  ;;  %v2365_v18 = vld [vmem:[%s2631_s2 + $0x10] sm:$0x77] }
  0x57   :  { %v2370_v19 = vld [vmem:[%s2631_s2 + $0x18] sm:$0x7]  ;;  %v1723_v20 = vld [vmem:[%s2630_s1 + $0x4] ss:$8 sps:$4 sm:$0xff]   ;;  %v1725_v21 = vld [vmem:[%s2630_s1] ss:$8 sps:$4 sm:$0xff]  }
  0x58   :  { %2648 = vst [vmem:[#allocation23_spill] sm:$0xff] %v2370_v19  ;;  %v1726_v22 = vld [vmem:[%s2630_s1 + $0x14] ss:$8 sps:$4 sm:$0xff]   ;;  %902 = vmatprep.subr.bf16.mxu0 %v1723_v20  ;;  %v1728_v23 = vld [vmem:[%s2630_s1 + $0x10] ss:$8 sps:$4 sm:$0xff]   ;;  %v688_v33 = vld [vmem:[%s2629_s0 + $0x8] sm:$0xff] }
  0x59   :  { %903 = vmatpush1.bf16.msra.mxu0 %v1725_v21  ;;  %v1729_v24 = vld [vmem:[%s2630_s1 + $0x24] ss:$8 sps:$4 sm:$0xff]   ;;  %v1731_v25 = vld [vmem:[%s2630_s1 + $0x20] ss:$8 sps:$4 sm:$0xff]   ;;  %v1732_v26 = vld [vmem:[%s2630_s1 + $0x34] ss:$8 sps:$4 sm:$0xff]   ;;  %v722_v34 = vpack.c.bf16 %v688_v33, %v688_v33 }
  0x5a   :  { %904 = vmatprep.subr.bf16.mxu0 %v1726_v22  ;;  %v1734_v27 = vld [vmem:[%s2630_s1 + $0x30] ss:$8 sps:$4 sm:$0xff]   ;;  %v1735_v28 = vld [vmem:[%s2630_s1 + $0x44] ss:$8 sps:$4 sm:$0xff]   ;;  %v1737_v29 = vld [vmem:[%s2630_s1 + $0x40] ss:$8 sps:$4 sm:$0xff]  }
  0x5b   :  { %v1738_v30 = vld [vmem:[%s2630_s1 + $0x54] ss:$8 sps:$4 sm:$0xff]   ;;  %v1740_v31 = vld [vmem:[%s2630_s1 + $0x50] ss:$8 sps:$4 sm:$0xff]   ;;  %v1741_v32 = vld [vmem:[%s2630_s1 + $0x64] ss:$8 sps:$4 sm:$0xff]   ;;  %934 = vmatprep.mubr.bf16.mxu0 %v722_v34 }
  0x5c   :  { %v1743_v35 = vld [vmem:[%s2630_s1 + $0x60] ss:$8 sps:$4 sm:$0xff]   ;;  %v1744_v36 = vld [vmem:[%s2630_s1 + $0x74] ss:$8 sps:$4 sm:$0xff]   ;;  %v1746_v37 = vld [vmem:[%s2630_s1 + $0x70] ss:$8 sps:$4 sm:$0xff]  }
  0x5d   :  { %905 = vmatpush1.bf16.msra.mxu0 %v1728_v23  ;;  %v1747_v38 = vld [vmem:[%s2630_s1 + $0x84] ss:$8 sps:$4 sm:$0xff]   ;;  %v1749_v39 = vld [vmem:[%s2630_s1 + $0x80] ss:$8 sps:$4 sm:$0xff]   ;;  %v1750_v40 = vld [vmem:[%s2630_s1 + $0x94] ss:$8 sps:$4 sm:$0xff]  }
  0x5e   :  { %906 = vmatprep.subr.bf16.mxu0 %v1729_v24  ;;  %v1752_v41 = vld [vmem:[%s2630_s1 + $0x90] ss:$8 sps:$4 sm:$0xff]   ;;  %v1753_v42 = vld [vmem:[%s2630_s1 + $0xa4] ss:$8 sps:$4 sm:$0xff]   ;;  %v1755_v43 = vld [vmem:[%s2630_s1 + $0xa0] ss:$8 sps:$4 sm:$0xff]  }
  0x5f   :  { %v1756_v44 = vld [vmem:[%s2630_s1 + $0xb4] ss:$8 sps:$4 sm:$0xff]   ;;  %v1758_v45 = vld [vmem:[%s2630_s1 + $0xb0] ss:$8 sps:$4 sm:$0xff]   ;;  %v1759_v46 = vld [vmem:[%s2630_s1 + $0xc4] ss:$8 sps:$4 sm:$0xff]  }
  0x60   :  { %v1761_v47 = vld [vmem:[%s2630_s1 + $0xc0] ss:$8 sps:$4 sm:$0xff]   ;;  %v1762_v48 = vld [vmem:[%s2630_s1 + $0xd4] ss:$8 sps:$4 sm:$0xff]   ;;  %v1764_v20 = vld [vmem:[%s2630_s1 + $0xd0] ss:$8 sps:$4 sm:$0xff]  }
  0x61   :  { %907 = vmatpush1.bf16.msra.mxu0 %v1731_v25  ;;  %v1765_v21 = vld [vmem:[%s2630_s1 + $0xe4] ss:$8 sps:$4 sm:$0xff]   ;;  %v1767_v22 = vld [vmem:[%s2630_s1 + $0xe0] ss:$8 sps:$4 sm:$0xff]   ;;  %v1768_v23 = vld [vmem:[%s2630_s1 + $0xf4] ss:$8 sps:$4 sm:$0xff]  }
  0x62   :  { %908 = vmatprep.subr.bf16.mxu0 %v1732_v26  ;;  %v1770_v24 = vld [vmem:[%s2630_s1 + $0xf0] ss:$8 sps:$4 sm:$0xff]   ;;  %v687_v25 = vld [vmem:[%s2629_s0] sm:$0xff] }
  0x63   :  { %v721_v26 = vpack.c.bf16 %v687_v25, %v687_v25 }
  0x65   :  { %909 = vmatpush1.bf16.msra.mxu0 %v1734_v27  ;;  %v724_v27 = vlaneseq }
  0x66   :  { %910 = vmatprep.subr.bf16.mxu0 %v1735_v28 }
  0x67   :  { %v2474_v28 = vshrl.u32 %v724_v27, 7 }
  0x69   :  { %911 = vmatpush1.bf16.msra.mxu0 %v1737_v29  ;;  %v2477_v29 = vsub.s32 0, %v2474_v28 }
  0x6a   :  { %912 = vmatprep.subr.bf16.mxu0 %v1738_v30  ;;  %v2482_v30 = vld [vmem:[%s2631_s2] sm:$0x77] }
  0x6b   :  { %2649 = vst [vmem:[#allocation24_spill] sm:$0xff] %v2477_v29 }
  0x6d   :  { %913 = vmatpush1.bf16.msra.mxu0 %v1740_v31  ;;  %v2485_v31 = vsub.s32 4, %v2474_v28 }
  0x6e   :  { %914 = vmatprep.subr.bf16.mxu0 %v1741_v32  ;;  %v727_v32 = vrot.slane %v2482_v30, %v2477_v29 }
  0x6f   :  { %v731_v33 = vrot.slane %v2482_v30, %v2485_v31 }
  0x70   :  { %v737_v34 = vrot.slane %v727_v32, %v2477_v29 }
  0x71   :  { %915 = vmatpush1.bf16.msra.mxu0 %v1743_v35  ;;  %v741_v35 = vrot.slane %v731_v33, %v2477_v29 }
  0x72   :  { %916 = vmatprep.subr.bf16.mxu0 %v1744_v36 }
  0x75   :  { %917 = vmatpush1.bf16.msra.mxu0 %v1746_v37 }
  0x76   :  { %918 = vmatprep.subr.bf16.mxu0 %v1747_v38 }
  0x79   :  { %919 = vmatpush1.bf16.msra.mxu0 %v1749_v39 }
  0x7a   :  { %920 = vmatprep.subr.bf16.mxu0 %v1750_v40 }
  0x7d   :  { %921 = vmatpush1.bf16.msra.mxu0 %v1752_v41 }
  0x7e   :  { %922 = vmatprep.subr.bf16.mxu0 %v1753_v42 }
  0x81   :  { %923 = vmatpush1.bf16.msra.mxu0 %v1755_v43 }
  0x82   :  { %924 = vmatprep.subr.bf16.mxu0 %v1756_v44 }
  0x85   :  { %925 = vmatpush1.bf16.msra.mxu0 %v1758_v45 }
  0x86   :  { %926 = vmatprep.subr.bf16.mxu0 %v1759_v46 }
  0x89   :  { %927 = vmatpush1.bf16.msra.mxu0 %v1761_v47 }
  0x8a   :  { %928 = vmatprep.subr.bf16.mxu0 %v1762_v48 }
  0x8d   :  { %929 = vmatpush1.bf16.msra.mxu0 %v1764_v20 }
  0x8e   :  { %930 = vmatprep.subr.bf16.mxu0 %v1765_v21 }
  0x91   :  { %931 = vmatpush1.bf16.msra.mxu0 %v1767_v22 }
  0x92   :  { %932 = vmatprep.subr.bf16.mxu0 %v1768_v23 }
  0x95   :  { %933 = vmatpush1.bf16.msra.mxu0 %v1770_v24 }
  0x98   :  { %935 = vmatmul.mubr.bf16.vlgmr.msra.gmra.mrb[0].mxu0 %v721_v26 }
 0x16b   :  { %v936_v36 = vpop.f32.mrb[0].mxu0 }
 0x16c   :  { %v937_v37 = vadd.f32 %v936_v36, %v737_v34  ;;  %v938_v38 = vpop.f32.mrb[1].mxu0 }
 0x16d   :  { %v939_v39 = vadd.f32 %v938_v38, %v741_v35  ;;  %v940_v40 = vpop.f32.mrb[2].mxu0 }
 0x16e   :  { %1771 = vtanh.f32 %v937_v37  ;;  %v941_v41 = vpop.f32.mrb[3].mxu0 }
 0x16f   :  { %1773 = vtanh.f32 %v939_v39 }
 0x178   :  { %v1772_v42 = vpop.eup %1771 }
 0x179   :  { %v1774_v43 = vpop.eup %1773  ;;  %v945_v44 = vrot.slane %v1772_v42, 4  ;;  %v959_v45 = vmul.f32 %v1772_v42, %v1772_v42 }
 0x17a   :  { %v951_v46 = vrot.slane %v1774_v43, 4  ;;  %v960_v47 = vmul.f32 %v1774_v43, %v1774_v43 }
 0x17b   :  { %v946_v48 = vadd.f32 %v1772_v42, %v945_v44  ;;  %v961_v20 = vrot.slane %v959_v45, 4 }
 0x17c   :  { %v952_v21 = vadd.f32 %v1774_v43, %v951_v46  ;;  %v967_v22 = vrot.slane %v960_v47, 4 }
 0x17d   :  { %v947_v23 = vrot.slane %v946_v48, 2  ;;  %v962_v24 = vadd.f32 %v961_v20, %v959_v45 }
 0x17e   :  { %v953_v25 = vrot.slane %v952_v21, 2  ;;  %v968_v26 = vadd.f32 %v967_v22, %v960_v47 }
 0x17f   :  { %v948_v27 = vadd.f32 %v947_v23, %v946_v48  ;;  %v963_v32 = vrot.slane %v962_v24, 2 }
 0x180   :  { %v954_v33 = vadd.f32 %v953_v25, %v952_v21  ;;  %v969_v34 = vrot.slane %v968_v26, 2 }
 0x181   :  { %v949_v35 = vrot.slane %v948_v27, 1  ;;  %v964_v36 = vadd.f32 %v963_v32, %v962_v24 }
 0x182   :  { %v955_v37 = vrot.slane %v954_v33, 1  ;;  %v970_v38 = vadd.f32 %v969_v34, %v968_v26 }
 0x183   :  { %v950_v39 = vadd.f32 %v949_v35, %v948_v27  ;;  %v965_v40 = vrot.slane %v964_v36, 1 }
 0x184   :  { %v956_v41 = vadd.f32 %v955_v37, %v954_v33  ;;  %v971_v19 = vrot.slane %v970_v38, 1  ;;  %v2494_v33 = vsub.s32 1, %v2474_v28 }
 0x185   :  { %v957_v44 = vmul.f32 0.125, %v950_v39  ;;  %v966_v8 = vadd.f32 %v965_v40, %v964_v36 }
 0x186   :  { %v958_v46 = vmul.f32 0.125, %v956_v41  ;;  %v972_v16 = vadd.f32 %v971_v19, %v970_v38  ;;  %v2497_v19 = vsub.s32 5, %v2474_v28 }
 0x187   :  { %v973_v7 = vmul.f32 0.125, %v966_v8  ;;  %v975_v45 = vmul.f32 %v957_v44, %v957_v44 }
 0x188   :  { %v974_v20 = vmul.f32 0.125, %v972_v16  ;;  %v976_v47 = vmul.f32 %v958_v46, %v958_v46 }
 0x189   :  { %v977_v48 = vsub.f32 %v973_v7, %v975_v45  ;;  %v2505_v45 = vsub.s32 2, %v2474_v28 }
 0x18a   :  { %v978_v22 = vsub.f32 %v974_v20, %v976_v47  ;;  %v2508_v20 = vsub.s32 6, %v2474_v28 }
 0x18b   :  { %v979_v21 = vmax.f32 %v977_v48, 0.0 }
 0x18c   :  { %v980_v23 = vmax.f32 %v978_v22, 0.0 }
 0x18d   :  { %v981_v25 = vadd.f32 1e-05, %v979_v21 }
 0x18e   :  { %v982_v24 = vadd.f32 1e-05, %v980_v23 }
 0x18f   :  { %1775 = vrsqrt.f32 %v981_v25 }
 0x190   :  { %1777 = vrsqrt.f32 %v982_v24 }
 0x199   :  { %v1776_v26 = vpop.eup %1775 }
 0x19a   :  { %v1778_v27 = vpop.eup %1777 }
 0x19b   :  { %v987_v32 = vcombine.low %v1776_v26, %v1778_v27 }
 0x19d   :  { %v988_v8 = vrot.slane %v987_v32, 7 }
 0x19f   :  { %v990_v16 = vmul.f32 %v988_v8, %v2482_v30 }
 0x1a1   :  { %v995_v7 = vrot.slane %v990_v16, %v2494_v33  ;;  %v999_v34 = vrot.slane %v990_v16, %v2497_v19 }
 0x1a3   :  { %v1002_v35 = vmul.f32 %v995_v7, %v957_v44  ;;  %v1003_v36 = vmul.f32 %v999_v34, %v958_v46  ;;  %v1013_v37 = vrot.slane %v995_v7, %v2494_v33  ;;  %v1017_v38 = vrot.slane %v999_v34, %v2494_v33 }
 0x1a5   :  { %v1006_v39 = vcombine.low %v1002_v35, %v1003_v36  ;;  %v1018_v40 = vmul.f32 %v1772_v42, %v1013_v37  ;;  %v1019_v41 = vmul.f32 %v1774_v43, %v1017_v38 }
 0x1a7   :  { %v1007_v47 = vrot.slane %v1006_v39, 6 }
 0x1a9   :  { %v1009_v48 = vsub.f32 %v2482_v30, %v1007_v47 }
 0x1ab   :  { %v1024_v22 = vrot.slane %v1009_v48, %v2505_v45  ;;  %v1028_v44 = vrot.slane %v1009_v48, %v2508_v20 }
 0x1ad   :  { %v1034_v46 = vrot.slane %v1024_v22, %v2505_v45  ;;  %v1038_v21 = vrot.slane %v1028_v44, %v2505_v45 }
 0x1af   :  { %v2515_v23 = vadd.f32 %v1034_v46, %v1018_v40  ;;  %v1040_v42 = vadd.f32 %v1038_v21, %v1019_v41 }
 0x1b0   :  { %1821 = dma.done.wait [#allocation4], 8192 }
 0x1b1   :  { %1822 = vsyncadd [#allocation4], 4294959104  ;;  %v1110_v43 = vpack.c.bf16 %v1040_v42, %v1040_v42  ;;  %v1046_v28 = vld [vmem:[#allocation2 + $0x8] sm:$0xff]  ;;  %v1048_v25 = vld [vmem:[#allocation2 + $0x18] sm:$0xff] }
 0x1b2   :  { %v1045_v24 = vld [vmem:[#allocation2] sm:$0xff]  ;;  %1149 = vmatprep.subr.bf16.mxu1 %v1046_v28  ;;  %1190 = vmatprep.subr.bf16.mxu0 %v1048_v25  ;;  %v1047_v30 = vld [vmem:[#allocation2 + $0x10] sm:$0xff]  ;;  %v1050_v26 = vld [vmem:[#allocation2 + $0x28] sm:$0xff] }
 0x1b3   :  { %1181 = vmatprep.mubr.bf16.mxu1 %v1110_v43  ;;  %1222 = vmatprep.mubr.bf16.mxu0 %v1110_v43  ;;  %v1052_v27 = vld [vmem:[#allocation2 + $0x38] sm:$0xff]  ;;  %v1049_v32 = vld [vmem:[#allocation2 + $0x20] sm:$0xff]  ;;  %v1051_v8 = vld [vmem:[#allocation2 + $0x30] sm:$0xff] }
 0x1b4   :  { %1150 = vmatpush1.bf16.msra.mxu1 %v1045_v24  ;;  %1191 = vmatpush1.bf16.msra.mxu0 %v1047_v30  ;;  %v1054_v16 = vld [vmem:[#allocation2 + $0x48] sm:$0xff]  ;;  %v1056_v7 = vld [vmem:[#allocation2 + $0x58] sm:$0xff]  ;;  %v1053_v34 = vld [vmem:[#allocation2 + $0x40] sm:$0xff] }
 0x1b5   :  { %1151 = vmatprep.subr.bf16.mxu1 %v1050_v26  ;;  %1192 = vmatprep.subr.bf16.mxu0 %v1052_v27  ;;  %v1055_v35 = vld [vmem:[#allocation2 + $0x50] sm:$0xff]  ;;  %v1058_v36 = vld [vmem:[#allocation2 + $0x68] sm:$0xff]  ;;  %v1060_v37 = vld [vmem:[#allocation2 + $0x78] sm:$0xff] }
 0x1b6   :  { %v1057_v38 = vld [vmem:[#allocation2 + $0x60] sm:$0xff]  ;;  %v1059_v39 = vld [vmem:[#allocation2 + $0x70] sm:$0xff]  ;;  %v1062_v40 = vld [vmem:[#allocation2 + $0x88] sm:$0xff] }
 0x1b7   :  { %v1064_v41 = vld [vmem:[#allocation2 + $0x98] sm:$0xff]  ;;  %v1061_v47 = vld [vmem:[#allocation2 + $0x80] sm:$0xff]  ;;  %v1063_v48 = vld [vmem:[#allocation2 + $0x90] sm:$0xff] }
 0x1b8   :  { %1152 = vmatpush1.bf16.msra.mxu1 %v1049_v32  ;;  %1193 = vmatpush1.bf16.msra.mxu0 %v1051_v8  ;;  %v1066_v22 = vld [vmem:[#allocation2 + $0xa8] sm:$0xff]  ;;  %v1068_v44 = vld [vmem:[#allocation2 + $0xb8] sm:$0xff]  ;;  %v1065_v46 = vld [vmem:[#allocation2 + $0xa0] sm:$0xff] }
 0x1b9   :  { %1153 = vmatprep.subr.bf16.mxu1 %v1054_v16  ;;  %1194 = vmatprep.subr.bf16.mxu0 %v1056_v7  ;;  %v1067_v21 = vld [vmem:[#allocation2 + $0xb0] sm:$0xff]  ;;  %v1070_v42 = vld [vmem:[#allocation2 + $0xc8] sm:$0xff]  ;;  %v1072_v43 = vld [vmem:[#allocation2 + $0xd8] sm:$0xff] }
 0x1ba   :  { %v1069_v28 = vld [vmem:[#allocation2 + $0xc0] sm:$0xff]  ;;  %v1071_v25 = vld [vmem:[#allocation2 + $0xd0] sm:$0xff]  ;;  %v1074_v24 = vld [vmem:[#allocation2 + $0xe8] sm:$0xff] }
 0x1bb   :  { %v1076_v30 = vld [vmem:[#allocation2 + $0xf8] sm:$0xff]  ;;  %v1073_v26 = vld [vmem:[#allocation2 + $0xe0] sm:$0xff]  ;;  %v1075_v27 = vld [vmem:[#allocation2 + $0xf0] sm:$0xff] }
 0x1bc   :  { %1154 = vmatpush1.bf16.msra.mxu1 %v1053_v34  ;;  %1195 = vmatpush1.bf16.msra.mxu0 %v1055_v35  ;;  %v1078_v32 = vld [vmem:[#allocation2 + $0x108] sm:$0xff]  ;;  %v1080_v8 = vld [vmem:[#allocation2 + $0x118] sm:$0xff]  ;;  %v1077_v16 = vld [vmem:[#allocation2 + $0x100] sm:$0xff] }
 0x1bd   :  { %1155 = vmatprep.subr.bf16.mxu1 %v1058_v36  ;;  %1196 = vmatprep.subr.bf16.mxu0 %v1060_v37  ;;  %v1079_v7 = vld [vmem:[#allocation2 + $0x110] sm:$0xff]  ;;  %v1082_v34 = vld [vmem:[#allocation2 + $0x128] sm:$0xff]  ;;  %v1084_v35 = vld [vmem:[#allocation2 + $0x138] sm:$0xff] }
 0x1be   :  { %v1081_v36 = vld [vmem:[#allocation2 + $0x120] sm:$0xff]  ;;  %v1083_v37 = vld [vmem:[#allocation2 + $0x130] sm:$0xff] }
 0x1c0   :  { %1156 = vmatpush1.bf16.msra.mxu1 %v1057_v38  ;;  %1197 = vmatpush1.bf16.msra.mxu0 %v1059_v39  ;;  %v1086_v38 = vld [vmem:[#allocation2 + $0x148] sm:$0xff]  ;;  %v1088_v39 = vld [vmem:[#allocation2 + $0x158] sm:$0xff] }
 0x1c1   :  { %1157 = vmatprep.subr.bf16.mxu1 %v1062_v40  ;;  %1198 = vmatprep.subr.bf16.mxu0 %v1064_v41  ;;  %v1085_v40 = vld [vmem:[#allocation2 + $0x140] sm:$0xff]  ;;  %v1087_v41 = vld [vmem:[#allocation2 + $0x150] sm:$0xff] }
 0x1c4   :  { %1158 = vmatpush1.bf16.msra.mxu1 %v1061_v47  ;;  %1199 = vmatpush1.bf16.msra.mxu0 %v1063_v48  ;;  %v1090_v47 = vld [vmem:[#allocation2 + $0x168] sm:$0xff]  ;;  %v1092_v48 = vld [vmem:[#allocation2 + $0x178] sm:$0xff] }
 0x1c5   :  { %1159 = vmatprep.subr.bf16.mxu1 %v1066_v22  ;;  %1200 = vmatprep.subr.bf16.mxu0 %v1068_v44  ;;  %v1089_v22 = vld [vmem:[#allocation2 + $0x160] sm:$0xff]  ;;  %v1091_v44 = vld [vmem:[#allocation2 + $0x170] sm:$0xff] }
 0x1c8   :  { %1160 = vmatpush1.bf16.msra.mxu1 %v1065_v46  ;;  %1201 = vmatpush1.bf16.msra.mxu0 %v1067_v21  ;;  %v1094_v46 = vld [vmem:[#allocation2 + $0x188] sm:$0xff]  ;;  %v1096_v21 = vld [vmem:[#allocation2 + $0x198] sm:$0xff] }
 0x1c9   :  { %1161 = vmatprep.subr.bf16.mxu1 %v1070_v42  ;;  %1202 = vmatprep.subr.bf16.mxu0 %v1072_v43  ;;  %v1093_v42 = vld [vmem:[#allocation2 + $0x180] sm:$0xff]  ;;  %v1095_v43 = vld [vmem:[#allocation2 + $0x190] sm:$0xff] }
 0x1cc   :  { %1162 = vmatpush1.bf16.msra.mxu1 %v1069_v28  ;;  %1203 = vmatpush1.bf16.msra.mxu0 %v1071_v25  ;;  %v1098_v28 = vld [vmem:[#allocation2 + $0x1a8] sm:$0xff]  ;;  %v1100_v25 = vld [vmem:[#allocation2 + $0x1b8] sm:$0xff] }
 0x1cd   :  { %1163 = vmatprep.subr.bf16.mxu1 %v1074_v24  ;;  %1204 = vmatprep.subr.bf16.mxu0 %v1076_v30  ;;  %v1097_v24 = vld [vmem:[#allocation2 + $0x1a0] sm:$0xff]  ;;  %v1099_v30 = vld [vmem:[#allocation2 + $0x1b0] sm:$0xff] }
 0x1d0   :  { %1164 = vmatpush1.bf16.msra.mxu1 %v1073_v26  ;;  %1205 = vmatpush1.bf16.msra.mxu0 %v1075_v27  ;;  %v1102_v26 = vld [vmem:[#allocation2 + $0x1c8] sm:$0xff]  ;;  %v1104_v27 = vld [vmem:[#allocation2 + $0x1d8] sm:$0xff] }
 0x1d1   :  { %1165 = vmatprep.subr.bf16.mxu1 %v1078_v32  ;;  %1206 = vmatprep.subr.bf16.mxu0 %v1080_v8  ;;  %v1101_v32 = vld [vmem:[#allocation2 + $0x1c0] sm:$0xff]  ;;  %v1103_v8 = vld [vmem:[#allocation2 + $0x1d0] sm:$0xff] }
 0x1d4   :  { %1166 = vmatpush1.bf16.msra.mxu1 %v1077_v16  ;;  %1207 = vmatpush1.bf16.msra.mxu0 %v1079_v7  ;;  %v1106_v16 = vld [vmem:[#allocation2 + $0x1e8] sm:$0xff]  ;;  %v1108_v7 = vld [vmem:[#allocation2 + $0x1f8] sm:$0xff] }
 0x1d5   :  { %1167 = vmatprep.subr.bf16.mxu1 %v1082_v34  ;;  %1208 = vmatprep.subr.bf16.mxu0 %v1084_v35  ;;  %v1105_v34 = vld [vmem:[#allocation2 + $0x1e0] sm:$0xff]  ;;  %v1107_v35 = vld [vmem:[#allocation2 + $0x1f0] sm:$0xff] }
 0x1d8   :  { %1168 = vmatpush1.bf16.msra.mxu1 %v1081_v36  ;;  %1209 = vmatpush1.bf16.msra.mxu0 %v1083_v37  ;;  %v1109_v36 = vpack.c.bf16 %v2515_v23, %v2515_v23  ;;  %v1116_v37 = vrot.slane %v2360_v17, %v2477_v29 }
 0x1d9   :  { %1169 = vmatprep.subr.bf16.mxu1 %v1086_v38  ;;  %1210 = vmatprep.subr.bf16.mxu0 %v1088_v39  ;;  %v1124_v38 = vrot.slane %v2365_v18, %v2477_v29  ;;  %v1120_v39 = vrot.slane %v2360_v17, %v2485_v31 }
 0x1db   :  { %v1144_v23 = vrot.slane %v1124_v38, %v2477_v29 }
 0x1dc   :  { %1170 = vmatpush1.bf16.msra.mxu1 %v1085_v40  ;;  %1211 = vmatpush1.bf16.msra.mxu0 %v1087_v41  ;;  %v1128_v40 = vrot.slane %v2365_v18, %v2485_v31  ;;  %v1136_v41 = vrot.slane %v1116_v37, %v2477_v29 }
 0x1dd   :  { %1171 = vmatprep.subr.bf16.mxu1 %v1090_v47  ;;  %1212 = vmatprep.subr.bf16.mxu0 %v1092_v48  ;;  %v1140_v47 = vrot.slane %v1120_v39, %v2477_v29 }
 0x1de   :  { %v1148_v48 = vrot.slane %v1128_v40, %v2477_v29 }
 0x1e0   :  { %1172 = vmatpush1.bf16.msra.mxu1 %v1089_v22  ;;  %1213 = vmatpush1.bf16.msra.mxu0 %v1091_v44 }
 0x1e1   :  { %1173 = vmatprep.subr.bf16.mxu1 %v1094_v46  ;;  %1214 = vmatprep.subr.bf16.mxu0 %v1096_v21 }
 0x1e4   :  { %1174 = vmatpush1.bf16.msra.mxu1 %v1093_v42  ;;  %1215 = vmatpush1.bf16.msra.mxu0 %v1095_v43 }
 0x1e5   :  { %1175 = vmatprep.subr.bf16.mxu1 %v1098_v28  ;;  %1216 = vmatprep.subr.bf16.mxu0 %v1100_v25 }
 0x1e8   :  { %1176 = vmatpush1.bf16.msra.mxu1 %v1097_v24  ;;  %1217 = vmatpush1.bf16.msra.mxu0 %v1099_v30 }
 0x1e9   :  { %1177 = vmatprep.subr.bf16.mxu1 %v1102_v26  ;;  %1218 = vmatprep.subr.bf16.mxu0 %v1104_v27 }
 0x1ec   :  { %1178 = vmatpush1.bf16.msra.mxu1 %v1101_v32  ;;  %1219 = vmatpush1.bf16.msra.mxu0 %v1103_v8 }
 0x1ed   :  { %1179 = vmatprep.subr.bf16.mxu1 %v1106_v16  ;;  %1220 = vmatprep.subr.bf16.mxu0 %v1108_v7 }
 0x1f0   :  { %1180 = vmatpush1.bf16.msra.mxu1 %v1105_v34  ;;  %1221 = vmatpush1.bf16.msra.mxu0 %v1107_v35 }
 0x1f1   :  { %1678 = vmatprep.subr.bf16.mxu1 %v2240_v57 }
 0x1f3   :  { %1182 = vmatmul.mubr.bf16.vlgmr.msra.gmra.mrb[0].mxu1 %v1109_v36  ;;  %1223 = vmatmul.mubr.bf16.vlgmr.msra.gmra.mrb[4].mxu0 %v1109_v36 }
 0x2c6   :  { %v1183_v22 = vpop.f32.mrb[0].mxu1  ;;  %v1224_v44 = vpop.f32.mrb[4].mxu0 }
 0x2c7   :  { %v1184_v46 = vadd.f32 %v1183_v22, %v1136_v41  ;;  %v1225_v21 = vadd.f32 %v1224_v44, %v1144_v23  ;;  %v1185_v42 = vpop.f32.mrb[1].mxu1  ;;  %v1226_v43 = vpop.f32.mrb[5].mxu0 }
 0x2c8   :  { %v1186_v28 = vadd.f32 %v1185_v42, %v1140_v47  ;;  %v1227_v25 = vadd.f32 %v1226_v43, %v1148_v48  ;;  %v1187_v24 = vpop.f32.mrb[2].mxu1  ;;  %v1228_v30 = vpop.f32.mrb[6].mxu0 }
 0x2c9   :  { %1779 = vtanh.f32 %v1184_v46  ;;  %v1188_v31 = vpop.f32.mrb[3].mxu1  ;;  %v1229_v26 = vpop.f32.mrb[7].mxu0 }
 0x2ca   :  { %1781 = vtanh.f32 %v1225_v21 }
 0x2cb   :  { %1783 = vtanh.f32 %v1186_v28 }
 0x2cc   :  { %1785 = vtanh.f32 %v1227_v25 }
 0x2d3   :  { %v2531_v27 = vpop.eup %1779 }
 0x2d4   :  { %v2533_v32 = vpop.eup %1781  ;;  %v1235_v8 = vrot.slane %v2531_v27, 4  ;;  %v1263_v16 = vmul.f32 %v2531_v27, %v2531_v27 }
 0x2d5   :  { %v2538_v7 = vpop.eup %1783  ;;  %v1247_v34 = vrot.slane %v2533_v32, 4  ;;  %v1265_v35 = vmul.f32 %v2533_v32, %v2533_v32 }
 0x2d6   :  { %v2543_v36 = vpop.eup %1785  ;;  %v1236_v37 = vadd.f32 %v2531_v27, %v1235_v8  ;;  %v1267_v38 = vrot.slane %v1263_v16, 4  ;;  %v1241_v39 = vrot.slane %v2538_v7, 4  ;;  %v1264_v40 = vmul.f32 %v2538_v7, %v2538_v7 }
 0x2d7   :  { %v1248_v41 = vadd.f32 %v2533_v32, %v1247_v34  ;;  %v1279_v23 = vrot.slane %v1265_v35, 4  ;;  %v1253_v47 = vrot.slane %v2543_v36, 4  ;;  %v1266_v48 = vmul.f32 %v2543_v36, %v2543_v36 }
 0x2d8   :  { %v1237_v22 = vrot.slane %v1236_v37, 2  ;;  %v1268_v44 = vadd.f32 %v1267_v38, %v1263_v16  ;;  %v1242_v46 = vadd.f32 %v2538_v7, %v1241_v39  ;;  %v1273_v21 = vrot.slane %v1264_v40, 4 }
 0x2d9   :  { %v1249_v42 = vrot.slane %v1248_v41, 2  ;;  %v1280_v43 = vadd.f32 %v1279_v23, %v1265_v35  ;;  %v1254_v28 = vadd.f32 %v2543_v36, %v1253_v47  ;;  %v1285_v25 = vrot.slane %v1266_v48, 4 }
 0x2da   :  { %v1238_v24 = vadd.f32 %v1237_v22, %v1236_v37  ;;  %v1269_v30 = vrot.slane %v1268_v44, 2  ;;  %v1243_v31 = vrot.slane %v1242_v46, 2  ;;  %v1274_v26 = vadd.f32 %v1273_v21, %v1264_v40 }
 0x2db   :  { %v1250_v8 = vadd.f32 %v1249_v42, %v1248_v41  ;;  %v1281_v34 = vrot.slane %v1280_v43, 2  ;;  %v1255_v29 = vrot.slane %v1254_v28, 2  ;;  %v1286_v15 = vadd.f32 %v1285_v25, %v1266_v48 }
 0x2dc   :  { %v1239_v6 = vrot.slane %v1238_v24, 1  ;;  %v1270_v14 = vadd.f32 %v1269_v30, %v1268_v44  ;;  %v1244_v5 = vadd.f32 %v1243_v31, %v1242_v46  ;;  %v1275_v16 = vrot.slane %v1274_v26, 2 }
 0x2dd   :  { %v1251_v38 = vrot.slane %v1250_v8, 1  ;;  %v1282_v39 = vadd.f32 %v1281_v34, %v1280_v43  ;;  %v1256_v13 = vadd.f32 %v1255_v29, %v1254_v28  ;;  %v1287_v4 = vrot.slane %v1286_v15, 2 }
 0x2de   :  { %v1240_v35 = vadd.f32 %v1239_v6, %v1238_v24  ;;  %v1271_v23 = vrot.slane %v1270_v14, 1  ;;  %v1245_v47 = vrot.slane %v1244_v5, 1  ;;  %v1276_v12 = vadd.f32 %v1275_v16, %v1274_v26 }
 0x2df   :  { %v1252_v37 = vadd.f32 %v1251_v38, %v1250_v8  ;;  %v1283_v22 = vrot.slane %v1282_v39, 1  ;;  %v1257_v3 = vrot.slane %v1256_v13, 1  ;;  %v1288_v40 = vadd.f32 %v1287_v4, %v1286_v15 }
 0x2e0   :  { %v1259_v41 = vmul.f32 0.125, %v1240_v35  ;;  %v1272_v21 = vadd.f32 %v1271_v23, %v1270_v14  ;;  %v1246_v42 = vadd.f32 %v1245_v47, %v1244_v5  ;;  %v1277_v48 = vrot.slane %v1276_v12, 1 }
 0x2e1   :  { %v1261_v25 = vmul.f32 0.125, %v1252_v37  ;;  %v1284_v44 = vadd.f32 %v1283_v22, %v1282_v39  ;;  %v1258_v46 = vadd.f32 %v1257_v3, %v1256_v13  ;;  %v1289_v30 = vrot.slane %v1288_v40, 1 }
 0x2e2   :  { %v1291_v31 = vmul.f32 0.125, %v1272_v21  ;;  %v1295_v43 = vmul.f32 %v1259_v41, %v1259_v41  ;;  %v1260_v29 = vmul.f32 0.125, %v1246_v42  ;;  %v1278_v28 = vadd.f32 %v1277_v48, %v1276_v12 }
 0x2e3   :  { %v1293_v6 = vmul.f32 0.125, %v1284_v44  ;;  %v1297_v24 = vmul.f32 %v1261_v25, %v1261_v25  ;;  %v1262_v34 = vmul.f32 0.125, %v1258_v46  ;;  %v1290_v26 = vadd.f32 %v1289_v30, %v1288_v40 }
 0x2e4   :  { %v1299_v8 = vsub.f32 %v1291_v31, %v1295_v43  ;;  %v1292_v16 = vmul.f32 0.125, %v1278_v28  ;;  %v1296_v38 = vmul.f32 %v1260_v29, %v1260_v29 }
 0x2e5   :  { %v1301_v4 = vsub.f32 %v1293_v6, %v1297_v24  ;;  %v1294_v15 = vmul.f32 0.125, %v1290_v26  ;;  %v1298_v14 = vmul.f32 %v1262_v34, %v1262_v34 }
 0x2e6   :  { %v1303_v5 = vmax.f32 %v1299_v8, 0.0  ;;  %v1300_v35 = vsub.f32 %v1292_v16, %v1296_v38 }
 0x2e7   :  { %v1305_v23 = vmax.f32 %v1301_v4, 0.0  ;;  %v1302_v39 = vsub.f32 %v1294_v15, %v1298_v14 }
 0x2e8   :  { %v1307_v3 = vadd.f32 1e-05, %v1303_v5  ;;  %v1304_v13 = vmax.f32 %v1300_v35, 0.0 }
 0x2e9   :  { %v1309_v47 = vadd.f32 1e-05, %v1305_v23  ;;  %v1306_v37 = vmax.f32 %v1302_v39, 0.0 }
 0x2ea   :  { %1787 = vrsqrt.f32 %v1307_v3  ;;  %v1308_v12 = vadd.f32 1e-05, %v1304_v13 }
 0x2eb   :  { %1789 = vrsqrt.f32 %v1309_v47  ;;  %v1310_v22 = vadd.f32 1e-05, %v1306_v37 }
 0x2ec   :  { %1791 = vrsqrt.f32 %v1308_v12 }
 0x2ed   :  { %1793 = vrsqrt.f32 %v1310_v22 }
 0x2f4   :  { %v1788_v40 = vpop.eup %1787 }
 0x2f5   :  { %v1790_v21 = vpop.eup %1789 }
 0x2f6   :  { %v1792_v42 = vpop.eup %1791 }
 0x2f7   :  { %v1794_v48 = vpop.eup %1793  ;;  %v1319_v44 = vcombine.low %v1788_v40, %v1792_v42 }
 0x2f8   :  { %v1320_v46 = vcombine.low %v1790_v21, %v1794_v48 }
 0x2f9   :  { %v1321_v30 = vrot.slane %v1319_v44, 7 }
 0x2fa   :  { %v1322_v31 = vrot.slane %v1320_v46, 7 }
 0x2fb   :  { %v1325_v43 = vmul.f32 %v1321_v30, %v2360_v17 }
 0x2fc   :  { %v1326_v28 = vmul.f32 %v1322_v31, %v2365_v18 }
 0x2fd   :  { %v1332_v6 = vrot.slane %v1325_v43, %v2494_v33  ;;  %v1336_v24 = vrot.slane %v1325_v43, %v2497_v19 }
 0x2fe   :  { %v1340_v26 = vrot.slane %v1326_v28, %v2494_v33  ;;  %v1344_v8 = vrot.slane %v1326_v28, %v2497_v19 }
 0x2ff   :  { %v1349_v16 = vmul.f32 %v1332_v6, %v1259_v41  ;;  %v1350_v38 = vmul.f32 %v1336_v24, %v1260_v29  ;;  %v1368_v4 = vrot.slane %v1332_v6, %v2494_v33  ;;  %v1372_v15 = vrot.slane %v1336_v24, %v2494_v33 }
 0x300   :  { %v1351_v14 = vmul.f32 %v1340_v26, %v1261_v25  ;;  %v1352_v5 = vmul.f32 %v1344_v8, %v1262_v34  ;;  %v1376_v35 = vrot.slane %v1340_v26, %v2494_v33  ;;  %v1380_v23 = vrot.slane %v1344_v8, %v2494_v33 }
 0x301   :  { %v1357_v39 = vcombine.low %v1349_v16, %v1350_v38  ;;  %v1381_v3 = vmul.f32 %v2531_v27, %v1368_v4  ;;  %v1382_v13 = vmul.f32 %v2538_v7, %v1372_v15 }
 0x302   :  { %v1358_v47 = vcombine.low %v1351_v14, %v1352_v5  ;;  %v1383_v19 = vmul.f32 %v2533_v32, %v1376_v35  ;;  %v1384_v41 = vmul.f32 %v2543_v36, %v1380_v23 }
 0x303   :  { %v1359_v29 = vrot.slane %v1357_v39, 6 }
 0x304   :  { %v1360_v37 = vrot.slane %v1358_v47, 6 }
 0x305   :  { %v1363_v12 = vsub.f32 %v2360_v17, %v1359_v29 }
 0x306   :  { %v1364_v25 = vsub.f32 %v2365_v18, %v1360_v37 }
 0x307   :  { %v1390_v34 = vrot.slane %v1363_v12, %v2505_v45  ;;  %v1394_v22 = vrot.slane %v1363_v12, %v2508_v20 }
 0x308   :  { %v1398_v40 = vrot.slane %v1364_v25, %v2505_v45  ;;  %v1402_v27 = vrot.slane %v1364_v25, %v2508_v20 }
 0x309   :  { %v1410_v7 = vrot.slane %v1390_v34, %v2505_v45  ;;  %v1414_v32 = vrot.slane %v1394_v22, %v2505_v45 }
 0x30a   :  { %v1418_v36 = vrot.slane %v1398_v40, %v2505_v45  ;;  %v1422_v21 = vrot.slane %v1402_v27, %v2505_v45 }
 0x30b   :  { %v1423_v42 = vadd.f32 %v1410_v7, %v1381_v3  ;;  %v1424_v17 = vadd.f32 %v1414_v32, %v1382_v13 }
 0x30c   :  { %v1425_v48 = vadd.f32 %v1418_v36, %v1383_v19  ;;  %v1426_v18 = vadd.f32 %v1422_v21, %v1384_v41 }
 0x30d   :  { %v1464_v44 = vpack.c.bf16 %v1424_v17, %v1424_v17 }
 0x30e   :  { %1823 = dma.done.wait [#allocation4 + $0x1], 4096 }
 0x30f   :  { %1824 = vsyncadd [#allocation4 + $0x1], 4294963200  ;;  %1679 = vmatpush3.bf16.msra.mxu1 %v2200_v49  ;;  %1503 = vmatprep.mubr.bf16.mxu1 %v1464_v44  ;;  %v1463_v49 = vpack.c.bf16 %v1423_v42, %v1423_v42  ;;  %v2656_v57 = vld [vmem:[#allocation15_spill] sm:$0xff]  ;;  %s1827_s0 = smov [#allocation5]  }
 0x310   :  { %1680 = vmatprep.subr.bf16.mxu1 %v2245_v58  ;;  %v2657_v58 = vld [vmem:[#allocation21_spill] sm:$0xff]  ;;  %s1601_s1 = sshll.u32 %s1827_s0, 4  ;;  %s1602_s1 = int_to_ptr.vmem [resolvable:$true] %s1601_s1 }
 0x311   :  { %s1799_s2 = scalar_lea.vmem %s1602_s1, 128  ;;  %p1804_p1 = scmp.lt.s32.totalorder %s1602_s1, %s1602_s1 }
 0x312   :  { %p1800_p0 = scmp.ne.s32.totalorder %s1602_s1, %s1799_s2  ;;  %p1805_p2 = scmp.lt.s32.totalorder %s1799_s2, %s1799_s2 }
 0x313   :  { %1681 = vmatpush3.bf16.msra.mxu1 %v2205_v50  ;;  %v1466_v50 = vpack.c.bf16 %v1426_v18, %v1426_v18 }
 0x314   :  { %1682 = vmatprep.subr.bf16.mxu1 %v2250_v59  ;;  %v2658_v59 = vld [vmem:[#allocation16_spill] sm:$0xff]  ;;  %p1806_p3 = por %p1805_p2, %p1804_p1 }
 0x316   :  { %p1807_p4 = pnand %p1806_p3, %p1800_p0 }
 0x317   :  { %1683 = vmatpush3.bf16.msra.mxu1 %v2210_v51  ;;  %v2650_v51 = vld [vmem:[#allocation12_spill] sm:$0xff] }
 0x318   :  { %1684 = vmatprep.subr.bf16.mxu1 %v2255_v60  ;;  %v2659_v60 = vld [vmem:[#allocation22_spill] sm:$0xff] }
 0x31b   :  { %1685 = vmatpush3.bf16.msra.mxu1 %v2215_v52  ;;  %v2651_v52 = vld [vmem:[#allocation18_spill] sm:$0xff] }
 0x31c   :  { %1686 = vmatprep.subr.bf16.mxu1 %v2260_v61  ;;  %v1465_v61 = vpack.c.bf16 %v1425_v48, %v1425_v48 }
 0x31f   :  { %1687 = vmatpush3.bf16.msra.mxu1 %v2220_v53  ;;  %v2652_v53 = vld [vmem:[#allocation13_spill] sm:$0xff] }
 0x320   :  { %1688 = vmatprep.subr.bf16.mxu1 %v2265_v62  ;;  %v2660_v62 = vld [vmem:[#allocation17_spill] sm:$0xff] }
 0x323   :  { %1689 = vmatpush3.bf16.msra.mxu1 %v2225_v54  ;;  %v2653_v54 = vld [vmem:[#allocation19_spill] sm:$0xff] }
 0x324   :  { %1690 = vmatprep.subr.bf16.mxu1 %v2270_v63 }
 0x327   :  { %1691 = vmatpush3.bf16.msra.mxu1 %v2230_v55  ;;  %v2654_v55 = vld [vmem:[#allocation14_spill] sm:$0xff] }
 0x328   :  { %1692 = vmatprep.subr.bf16.mxu1 %v2275_v0 }
 0x32b   :  { %1693 = vmatpush3.bf16.msra.mxu1 %v2235_v56  ;;  %v2655_v56 = vld [vmem:[#allocation20_spill] sm:$0xff] }
 0x32c   :  { %1700 = vmatprep.subr.bf16.mxu1 %v2320_v9 }
 0x32e   :  { %1504 = vmatmul.mubr.bf16.vlgmr.msra.gmra.mrb[4].mxu1 %v1463_v49 }
 0x32f   :  { %1701 = vmatpush3.bf16.msra.mxu1 %v2280_v1  ;;  %1543 = vmatprep.mubr.bf16.mxu1 %v1466_v50 }
 0x330   :  { %1702 = vmatprep.subr.bf16.mxu1 %v2325_v10  ;;  %v2661_v10 = vld [vmem:[#allocation24_spill] sm:$0xff] }
 0x333   :  { %1703 = vmatpush3.bf16.msra.mxu1 %v2285_v2 }
 0x334   :  { %1704 = vmatprep.subr.bf16.mxu1 %v2330_v11  ;;  %v2662_v11 = vld [vmem:[#allocation23_spill] sm:$0xff] }
 0x335   :  { %v1470_v20 = vrot.slane %v2662_v11, %v2661_v10 }
 0x337   :  { %1705 = vmatpush3.bf16.msra.mxu1 %v2650_v51 }
 0x338   :  { %1706 = vmatprep.subr.bf16.mxu1 %v2651_v52 }
 0x33b   :  { %1707 = vmatpush3.bf16.msra.mxu1 %v2652_v53 }
 0x33c   :  { %1708 = vmatprep.subr.bf16.mxu1 %v2653_v54 }
 0x33f   :  { %1709 = vmatpush3.bf16.msra.mxu1 %v2654_v55 }
 0x340   :  { %1710 = vmatprep.subr.bf16.mxu1 %v2655_v56 }
 0x343   :  { %1711 = vmatpush3.bf16.msra.mxu1 %v2656_v57 }
 0x344   :  { %1712 = vmatprep.subr.bf16.mxu1 %v2657_v58 }
 0x347   :  { %1713 = vmatpush3.bf16.msra.mxu1 %v2658_v59 }
 0x348   :  { %1714 = vmatprep.subr.bf16.mxu1 %v2659_v60 }
 0x34b   :  { %1715 = vmatpush3.bf16.msra.mxu1 %v2660_v62 }
 0x34e   :  { %1544 = vmatmul.mubr.bf16.vlgmr.msra.gmra.mrb[8].mxu1 %v1465_v61 }
 0x401   :  { %v1694_v63 = vpop.f32.mrb[4].mxu1 }
 0x402   :  { %v1695_v0 = vpop.f32.mrb[5].mxu1 }
 0x403   :  { %v1696_v1 = vadd.f32 %v1695_v0, %v1694_v63  ;;  %v1697_v2 = vpop.f32.mrb[6].mxu1 }
 0x404   :  { %v1698_v9 = vpop.f32.mrb[7].mxu1 }
 0x405   :  { %v1506_v31 = vadd.f32 %v1696_v1, %v1470_v20 }
 0x421   :  { %v1716_v46 = vpop.f32.mrb[8].mxu1 }
 0x422   :  { %v1717_v30 = vpop.f32.mrb[9].mxu1 }
 0x423   :  { %v1718_v43 = vadd.f32 %v1717_v30, %v1716_v46  ;;  %v1719_v28 = vpop.f32.mrb[10].mxu1 }
 0x424   :  { %v1720_v6 = vpop.f32.mrb[11].mxu1 }
 0x425   :  { %v1546_v24 = vadd.f32 %v1718_v43, %v1506_v31 }
 0x427   :  { %1795 = vtanh.f32 %v1546_v24 }
 0x431   :  { %v1796_v26 = vpop.eup %1795 }
 0x432   :  { %v1552_v8 = vrot.slane %v1796_v26, 4  ;;  %v1559_v16 = vmul.f32 %v1796_v26, %v1796_v26 }
 0x434   :  { %v1553_v38 = vadd.f32 %v1796_v26, %v1552_v8  ;;  %v1560_v4 = vrot.slane %v1559_v16, 4 }
 0x436   :  { %v1554_v15 = vrot.slane %v1553_v38, 2  ;;  %v1561_v14 = vadd.f32 %v1560_v4, %v1559_v16 }
 0x438   :  { %v1555_v5 = vadd.f32 %v1554_v15, %v1553_v38  ;;  %v1562_v35 = vrot.slane %v1561_v14, 2 }
 0x43a   :  { %v1556_v23 = vrot.slane %v1555_v5, 1  ;;  %v1563_v39 = vadd.f32 %v1562_v35, %v1561_v14 }
 0x43c   :  { %v1557_v3 = vadd.f32 %v1556_v23, %v1555_v5  ;;  %v1564_v13 = vrot.slane %v1563_v39, 1 }
 0x43e   :  { %v1558_v47 = vmul.f32 0.125, %v1557_v3  ;;  %v1565_v19 = vadd.f32 %v1564_v13, %v1563_v39 }
 0x440   :  { %v1566_v41 = vmul.f32 0.125, %v1565_v19  ;;  %v1567_v29 = vmul.f32 %v1558_v47, %v1558_v47 }
 0x442   :  { %v1568_v37 = vsub.f32 %v1566_v41, %v1567_v29 }
 0x444   :  { %v1569_v12 = vmax.f32 %v1568_v37, 0.0 }
 0x446   :  { %v1570_v25 = vadd.f32 1e-05, %v1569_v12 }
 0x448   :  { %1797 = vrsqrt.f32 %v1570_v25 }
 0x452   :  { %v1798_v34 = vpop.eup %1797 }
 0x453   :  { %v1572_v22 = vmul.f32 %v1798_v34, %v2662_v11 }
 0x455   :  { %v1577_v40 = vrot.slane %v1572_v22, %v2494_v33 }
 0x457   :  { %v1579_v27 = vmul.f32 %v1577_v40, %v1558_v47  ;;  %v1588_v36 = vmul.f32 %v1796_v26, %v1577_v40 }
 0x459   :  { %v1581_v7 = vrot.slane %v1579_v27, 6 }
 0x45b   :  { %v1583_v32 = vsub.f32 %v2662_v11, %v1581_v7 }
 0x45d   :  { %v1592_v21 = vrot.slane %v1583_v32, %v2505_v45 }
 0x45f   :  { %v1593_v42 = vadd.f32 %v1592_v21, %v1588_v36 }
 0x461   :  { %1594 = vst [vmem:[#allocation5] sm:$0xff] %v1593_v42 }
 0x462   :  { %1810 = shalt.err (!%p1807_p4)
}
 0x463   :  { %s1811_s27 = scalar_lea.hbm %s2634_s5, 128 }
 0x464   :  { %p1812_p5 = scmp.ne.s32.totalorder %s2634_s5, %s1811_s27  ;;  %p1815_p6 = scmp.lt.u32.totalorder %s1811_s27, %s2634_s5 }
 0x466   :  { %p1817_p7 = pnand %p1815_p6, %p1812_p5 }
 0x468   :  { %1820 = shalt.err (!%p1817_p7)
}
 0x469   :  { %1604 = dma.vmem_to_hbm [thread:$0]  %s1602_s1, 128, %s2634_s5, [#allocation6]  }
 0x46a   :  { %1825 = dma.done.wait [#allocation6], 128  }
 0x46b   :  { %1826 = vsyncadd [#allocation6], 4294967168 }
 0x46c   :  { %1608 = vsyncpa [#allocation6], 1 }
 0x46d   :  { %1609 = vsyncmov [#allocation4] }
 0x470   :  { %s1610_s9 = vpop.sfrf %1609 }
 0x471   :  { %p1676_p8 = scmp.ne.s32.totalorder %s1610_s9, 0 }
 0x473   :  { %1614 = shalt.err (%p1676_p8)  }
 0x474   :  { %1616 = vsyncmov [#allocation4 + $0x1] }
 0x477   :  { %s1617_s10 = vpop.sfrf %1616 }
 0x478   :  { %p1677_p9 = scmp.ne.s32.totalorder %s1617_s10, 0 }
 0x47a   :  { %1621 = shalt.err (%p1677_p9)  }

</bundles_post_ra>
